<compile_context>
chip_gen: v7x
topology: tpu7x:2x2x1
jax: 0.10.0
libtpu: 0.0.40
codegen_flags: <defaults>
</compile_context>

<pallas_src>
import math
import functools

import jax
import jax.numpy as jnp
from jax.experimental import pallas as pl
from jax.experimental.pallas import tpu as pltpu


# ---------------------------------------------------------------- generation tuning
def _vmem_capacity_bytes():
    try:
        return int(pltpu.get_tpu_info().vmem_capacity_bytes)
    except Exception:
        return 64 * 1024 * 1024                       # conservative (v7x-sized) fallback


_VMEM_CAP = _vmem_capacity_bytes()
VMEM_LIMIT = int(_VMEM_CAP * 0.75)                    # ~96 MiB v5e/v6e, ~48 MiB v7x
_WEIGHT_BUF_DEPTH = 3 if _VMEM_CAP > (96 * 1024 * 1024) else 2


def _buffered_spec(shape, index_map, depth):
    """BlockSpec for streamed weights/masks; deeper multi-buffering where VMEM allows."""
    if depth and depth > 2:
        try:
            return pl.BlockSpec(shape, index_map, pipeline_mode=pl.Buffered(depth))
        except Exception:                             # jax without BlockSpec.pipeline_mode
            pass
    return pl.BlockSpec(shape, index_map)


# -------------------------------------------------------------------------- kernels
def _embed_kernel(coord_ref, w_ref, flag_ref, pos_ref, o_ref):
    """coord @ W_coord fused with the (coord_emb | flag_emb | pos_emb) concat."""
    TB, Np, C = coord_ref.shape
    D = w_ref.shape[1]
    coor = jnp.dot(coord_ref[...].reshape(TB * Np, C), w_ref[...],
                   preferred_element_type=jnp.float32).reshape(TB, Np, D)
    o_ref[...] = jnp.concatenate([coor, flag_ref[...], pos_ref[...]], axis=-1)


def embed(coord, coord_w, flag_emb, pos_emb, *, tb):
    B, Np, C = coord.shape
    D = coord_w.shape[1]
    return pl.pallas_call(
        _embed_kernel,
        out_shape=jax.ShapeDtypeStruct((B, Np, 3 * D), jnp.float32),
        grid_spec=pltpu.PrefetchScalarGridSpec(
            num_scalar_prefetch=0,
            grid=(B // tb,),
            in_specs=[
                pl.BlockSpec((tb, Np, C), lambda r: (r, 0, 0)),
                pl.BlockSpec((C, D), lambda r: (0, 0)),
                pl.BlockSpec((tb, Np, D), lambda r: (r, 0, 0)),
                pl.BlockSpec((tb, Np, D), lambda r: (r, 0, 0)),
            ],
            out_specs=pl.BlockSpec((tb, Np, 3 * D), lambda r: (r, 0, 0)),
        ),
        compiler_params=pltpu.CompilerParams(
            dimension_semantics=("parallel",), vmem_limit_bytes=VMEM_LIMIT),
    )(coord, coord_w, flag_emb, pos_emb)


def _attn_linear_kernel(scin_ref, shin_ref, h_ref, wqkv_ref, wo_ref, mask_ref,
                        linw_ref, linb_ref, valid_ref, o_ref, stats_ref,
                        *, n_heads, dkp):
    """Row tile of one layer: prev-BN2 affine, 3x MHA + skip, tmp_linear accumulation.

    grid axis 0 = row (batch) tile ("parallel"), axis 1 = attention block ("arbitrary").
    The partial (h + att_a) @ lin_w[a] accumulates directly into o_ref (no scratch);
    the last attention block fuses bias+ReLU and emits BatchNorm1 partial statistics.
    """
    a = pl.program_id(1)
    TB, Np, D3 = h_ref.shape
    H = n_heads
    HD = H * dkp
    M = TB * Np

    # incoming affine == previous layer's BatchNorm2 (identity for the first layer)
    x = h_ref[...] * scin_ref[...] + shin_ref[...]                       # (TB,Np,D3) f32
    xf = x.reshape(M, D3)
    xb = xf.astype(jnp.bfloat16)

    # fused lane-dense QKV projection (Q columns pre-scaled by 1/sqrt(dk) at init)
    qkv = jnp.dot(xb, wqkv_ref[0], preferred_element_type=jnp.float32)   # (M, 3*HD)
    mask = mask_ref[0].astype(jnp.float32)                               # (TB, Np, Np)

    # per-head softmax attention; dkp is a 128-lane multiple -> aligned slices/concat
    heads = []
    for hd in range(H):
        q = qkv[:, hd * dkp:(hd + 1) * dkp].reshape(TB, Np, dkp).astype(jnp.bfloat16)
        k = qkv[:, HD + hd * dkp:HD + (hd + 1) * dkp].reshape(TB, Np, dkp).astype(jnp.bfloat16)
        v = qkv[:, 2 * HD + hd * dkp:2 * HD + (hd + 1) * dkp].reshape(TB, Np, dkp).astype(jnp.bfloat16)
        s = jnp.einsum('bqd,bkd->bqk', q, k,
                       preferred_element_type=jnp.float32) + mask
        m = jnp.max(s, axis=-1, keepdims=True)
        e = jnp.exp(s - m)
        p = e * pl.reciprocal(jnp.sum(e, axis=-1, keepdims=True), approx=True)
        heads.append(jnp.einsum('bqk,bkd->bqd', p.astype(jnp.bfloat16), v,
                                preferred_element_type=jnp.float32))

    head_cat = jnp.concatenate(heads, axis=-1).reshape(M, HD).astype(jnp.bfloat16)
    att = jnp.dot(head_cat, wo_ref[0], preferred_element_type=jnp.float32)  # (M, D3)
    hs = xf + att                                                           # SkipConnection

    partial = jnp.dot(hs.astype(jnp.bfloat16), linw_ref[0],
                      preferred_element_type=jnp.float32).reshape(TB, Np, D3)

    @pl.when(a == 0)
    def _():
        o_ref[...] = partial

    @pl.when(a != 0)
    def _():
        o_ref[...] += partial

    @pl.when(a == pl.num_programs(1) - 1)
    def _():
        y = jnp.maximum(o_ref[...] + linb_ref[...], 0.0)     # tmp_linear bias + ReLU
        o_ref[...] = y
        # BatchNorm1 partial stats over VALID rows only (N-padding rows excluded).
        # TODO(synk): one-pass sum/sum-sq can lose precision when |mean| >> std.
        yv = (y * valid_ref[...]).reshape(M, D3)
        s1 = jnp.sum(yv, axis=0, keepdims=True)
        s2 = jnp.sum(yv * y.reshape(M, D3), axis=0, keepdims=True)
        stats_ref[...] = jnp.concatenate([s1, s2], axis=0)[None]


def _bn_ff_kernel(hh_ref, sc1_ref, sh1_ref, ffw_ref, ffb_ref, valid_ref,
                  z_ref, stats_ref):
    """BN1 affine (pre-reduced), position-wise FF + skip, BatchNorm2 partial stats."""
    TB, Np, D3 = hh_ref.shape
    M = TB * Np
    y = (hh_ref[...] * sc1_ref[...] + sh1_ref[...]).reshape(M, D3)       # BN1 applied
    ff = jnp.maximum(
        jnp.dot(y.astype(jnp.bfloat16), ffw_ref[...],
                preferred_element_type=jnp.float32) + ffb_ref[...], 0.0)
    z = y + ff                                                           # SkipConnection
    zv = z * valid_ref[...].reshape(M, 1)
    s1 = jnp.sum(zv, axis=0, keepdims=True)
    s2 = jnp.sum(zv * z, axis=0, keepdims=True)
    z_ref[...] = z.reshape(TB, Np, D3)
    stats_ref[...] = jnp.concatenate([s1, s2], axis=0)[None]


def _tail_kernel(h_ref, scf_ref, shf_ref, pm_ref, w1_ref, b1_ref, w2_ref, b2_ref,
                 w3_ref, b3_ref, o_ref):
    """Final BN2 affine, masked sum pool, classifier MLP, log_softmax, fused."""
    hn = h_ref[...] * scf_ref[...] + shf_ref[...]
    g = jnp.sum(hn * pm_ref[...], axis=1)                                # (TBt, D3)
    z = jnp.maximum(jnp.dot(g.astype(jnp.bfloat16), w1_ref[...],
                            preferred_element_type=jnp.float32) + b1_ref[...], 0.0)
    z = jnp.maximum(jnp.dot(z.astype(jnp.bfloat16), w2_ref[...],
                            preferred_element_type=jnp.float32) + b2_ref[...], 0.0)
    z = jnp.dot(z.astype(jnp.bfloat16), w3_ref[...],
                preferred_element_type=jnp.float32) + b3_ref[...]
    m = jnp.max(z, axis=-1, keepdims=True)
    lse = jnp.log(jnp.sum(jnp.exp(z - m), axis=-1, keepdims=True))
    o_ref[...] = z - m - lse


# --------------------------------------------------------------------- layer wrapper
def _bn_affine(stats, count, gamma, beta, eps=1e-5):
    """Reduce per-tile partial stats -> fused per-channel affine (tiny XLA glue)."""
    s1 = jnp.sum(stats[:, 0, :], axis=0)
    s2 = jnp.sum(stats[:, 1, :], axis=0)
    mean = s1 / count
    var = jnp.maximum(s2 / count - mean * mean, 0.0)
    scale = gamma.reshape(-1) * jax.lax.rsqrt(var + eps)
    shift = beta.reshape(-1) - mean * scale
    return scale.reshape(1, -1), shift.reshape(1, -1)


def transformer_layer(h, scale_in, shift_in, lp, masks, valid, count,
                      *, n_heads, dkp, tb, wdepth):
    B, Np, D3 = h.shape
    R = B // tb
    HD = n_heads * dkp

    kernel_a = functools.partial(_attn_linear_kernel, n_heads=n_heads, dkp=dkp)
    hh, stats1 = pl.pallas_call(
        kernel_a,
        out_shape=(jax.ShapeDtypeStruct((B, Np, D3), jnp.float32),
                   jax.ShapeDtypeStruct((R, 2, D3), jnp.float32)),
        grid_spec=pltpu.PrefetchScalarGridSpec(
            num_scalar_prefetch=0,
            grid=(R, 3),                                                  # rows x attn blocks
            in_specs=[
                pl.BlockSpec((1, D3), lambda r, a: (0, 0)),               # prev BN2 scale
                pl.BlockSpec((1, D3), lambda r, a: (0, 0)),               # prev BN2 shift
                pl.BlockSpec((tb, Np, D3), lambda r, a: (r, 0, 0)),       # h row tile
                _buffered_spec((1, D3, 3 * HD), lambda r, a: (a, 0, 0), wdepth),   # wqkv[a]
                _buffered_spec((1, HD, D3), lambda r, a: (a, 0, 0), wdepth),       # wo[a]
                _buffered_spec((1, tb, Np, Np), lambda r, a: (a, r, 0, 0), wdepth),  # mask[a]
                _buffered_spec((1, D3, D3), lambda r, a: (a, 0, 0), wdepth),       # lin_w[a]
                pl.BlockSpec((1, D3), lambda r, a: (0, 0)),               # lin_b
                pl.BlockSpec((tb, Np, 1), lambda r, a: (r, 0, 0)),        # valid rows
            ],
            out_specs=[
                pl.BlockSpec((tb, Np, D3), lambda r, a: (r, 0, 0)),       # hh (acc in place)
                pl.BlockSpec((1, 2, D3), lambda r, a: (r, 0, 0)),         # BN1 partial stats
            ],
        ),
        compiler_params=pltpu.CompilerParams(
            dimension_semantics=("parallel", "arbitrary"),
            vmem_limit_bytes=VMEM_LIMIT),
    )(scale_in, shift_in, h, lp['wqkv'], lp['wo'], masks,
      lp['lin_w'], lp['lin_b'], valid)

    sc1, sh1 = _bn_affine(stats1, count, lp['n1_g'], lp['n1_b'])

    z, stats2 = pl.pallas_call(
        _bn_ff_kernel,
        out_shape=(jax.ShapeDtypeStruct((B, Np, D3), jnp.float32),
                   jax.ShapeDtypeStruct((R, 2, D3), jnp.float32)),
        grid_spec=pltpu.PrefetchScalarGridSpec(
            num_scalar_prefetch=0,
            grid=(R,),
            in_specs=[
                pl.BlockSpec((tb, Np, D3), lambda r: (r, 0, 0)),
                pl.BlockSpec((1, D3), lambda r: (0, 0)),
                pl.BlockSpec((1, D3), lambda r: (0, 0)),
                pl.BlockSpec((D3, D3), lambda r: (0, 0)),
                pl.BlockSpec((1, D3), lambda r: (0, 0)),
                pl.BlockSpec((tb, Np, 1), lambda r: (r, 0, 0)),
            ],
            out_specs=[
                pl.BlockSpec((tb, Np, D3), lambda r: (r, 0, 0)),
                pl.BlockSpec((1, 2, D3), lambda r: (r, 0, 0)),
            ],
        ),
        compiler_params=pltpu.CompilerParams(
            dimension_semantics=("parallel",), vmem_limit_bytes=VMEM_LIMIT),
    )(hh, sc1, sh1, lp['ff_w'], lp['ff_b'], valid)

    sc2, sh2 = _bn_affine(stats2, count, lp['n2_g'], lp['n2_b'])
    return z, sc2, sh2


def classifier_tail(h, scale_f, shift_f, padding_mask, p, *, tbt):
    B, Np, D3 = h.shape
    n_classes = p['cls_w3'].shape[1]
    F = p['cls_w1'].shape[1]
    return pl.pallas_call(
        _tail_kernel,
        out_shape=jax.ShapeDtypeStruct((B, n_classes), jnp.float32),
        grid_spec=pltpu.PrefetchScalarGridSpec(
            num_scalar_prefetch=0,
            grid=(B // tbt,),
            in_specs=[
                pl.BlockSpec((tbt, Np, D3), lambda r: (r, 0, 0)),
                pl.BlockSpec((1, D3), lambda r: (0, 0)),
                pl.BlockSpec((1, D3), lambda r: (0, 0)),
                pl.BlockSpec((tbt, Np, 1), lambda r: (r, 0, 0)),
                pl.BlockSpec((D3, F), lambda r: (0, 0)),
                pl.BlockSpec((1, F), lambda r: (0, 0)),
                pl.BlockSpec((F, F), lambda r: (0, 0)),
                pl.BlockSpec((1, F), lambda r: (0, 0)),
                pl.BlockSpec((F, n_classes), lambda r: (0, 0)),
                pl.BlockSpec((1, n_classes), lambda r: (0, 0)),
            ],
            out_specs=pl.BlockSpec((tbt, n_classes), lambda r: (r, 0)),
        ),
        compiler_params=pltpu.CompilerParams(
            dimension_semantics=("parallel",), vmem_limit_bytes=VMEM_LIMIT),
    )(h, scale_f, shift_f, padding_mask, p['cls_w1'], p['cls_b1'],
      p['cls_w2'], p['cls_b2'], p['cls_w3'], p['cls_b3'])


# ----------------------------------------------------------------------- parameters
def init_params(key, *, coord_input_dim, feat_dict_size, n_layers, n_heads,
                embed_dim, feedforward_dim, n_classes):
    D = embed_dim
    D3 = 3 * D                                     # transformer hidden width
    assert D3 % n_heads == 0
    dk = D3 // n_heads                             # PyTorch key/val dim
    dkp = ((dk + 127) // 128) * 128                # lane-padded per-head width
    HD = n_heads * dkp

    keys = iter(jax.random.split(key, 8 + 24 * n_layers))

    def unif(shape, stdv):
        return jax.random.uniform(next(keys), shape, jnp.float32, -stdv, stdv)

    def fused_attention():
        norm = 1.0 / math.sqrt(dk)                 # folded into Q columns
        wq = unif((n_heads, D3, dk), 1.0 / math.sqrt(dk)) * norm
        wk = unif((n_heads, D3, dk), 1.0 / math.sqrt(dk))
        wv = unif((n_heads, D3, dk), 1.0 / math.sqrt(dk))
        wo = unif((n_heads, dk, D3), 1.0 / math.sqrt(D3))

        def lane_pad(w):                           # (H, D3, dk) -> (D3, H*dkp), 128-aligned
            wp = jnp.pad(w, ((0, 0), (0, 0), (0, dkp - dk)))
            return jnp.transpose(wp, (1, 0, 2)).reshape(D3, HD)

        wqkv = jnp.concatenate([lane_pad(wq), lane_pad(wk), lane_pad(wv)], axis=1)
        wo_p = jnp.pad(wo, ((0, 0), (0, dkp - dk), (0, 0))).reshape(HD, D3)
        return wqkv, wo_p

    params = {
        'coord_w': unif((coord_input_dim, D), 1.0 / math.sqrt(coord_input_dim)),
        'feat_embed': unif((feat_dict_size, D), 1.0 / math.sqrt(D)),
        'layers': [],
    }
    for _ in range(n_layers):
        wqkv_l, wo_l = [], []
        for _ in range(3):
            wqkv, wo = fused_attention()
            wqkv_l.append(wqkv)
            wo_l.append(wo)
        lin_w = unif((3 * D3, D3), 1.0 / math.sqrt(3 * D3))
        params['layers'].append({
            'wqkv': jnp.stack(wqkv_l).astype(jnp.bfloat16),            # (3, D3, 3*HD)
            'wo': jnp.stack(wo_l).astype(jnp.bfloat16),                # (3, HD, D3)
            'lin_w': lin_w.reshape(3, D3, D3).astype(jnp.bfloat16),    # row chunks
            'lin_b': unif((1, D3), 1.0 / math.sqrt(3 * D3)),
            'n1_g': unif((1, D3), 1.0 / math.sqrt(D3)),
            'n1_b': unif((1, D3), 1.0 / math.sqrt(D3)),
            'ff_w': unif((D3, D3), 1.0 / math.sqrt(D3)).astype(jnp.bfloat16),
            'ff_b': unif((1, D3), 1.0 / math.sqrt(D3)),
            'n2_g': unif((1, D3), 1.0 / math.sqrt(D3)),
            'n2_b': unif((1, D3), 1.0 / math.sqrt(D3)),
        })

    F = feedforward_dim
    params['cls_w1'] = unif((D3, F), 1.0 / math.sqrt(D3)).astype(jnp.bfloat16)
    params['cls_b1'] = unif((1, F), 1.0 / math.sqrt(D3))
    params['cls_w2'] = unif((F, F), 1.0 / math.sqrt(F)).astype(jnp.bfloat16)
    params['cls_b2'] = unif((1, F), 1.0 / math.sqrt(F))
    params['cls_w3'] = unif((F, n_classes), 1.0 / math.sqrt(F)).astype(jnp.bfloat16)
    params['cls_b3'] = unif((1, n_classes), 1.0 / math.sqrt(F))
    return params


# -------------------------------------------------------------------------- forward
def mgt_forward(params, coord, flag, pos, masks, padding_mask, *, n_heads,
                batch_tile=1):
    B, N, _ = coord.shape
    assert B % batch_tile == 0
    Np = -(-N // 8) * 8                       # pad graph size to a sublane multiple
    pad = Np - N

    coord_p = jnp.pad(coord, ((0, 0), (0, pad), (0, 0)))
    flag_p = jnp.pad(flag, ((0, 0), (0, pad)))
    pos_p = jnp.pad(pos, ((0, 0), (0, pad)))
    # padded key columns / query rows are fully masked; masks streamed as bf16
    masks_p = jnp.pad(masks, ((0, 0), (0, 0), (0, pad), (0, pad)),
                      constant_values=-1e9).astype(jnp.bfloat16)
    pm_p = jnp.pad(padding_mask, ((0, 0), (0, pad), (0, 0)))
    row_valid = (jnp.arange(Np) < N).astype(jnp.float32)
    valid = jnp.tile(row_valid[None, :, None], (B, 1, 1))        # (B, Np, 1)
    count = float(B * N)                     # BatchNorm stats over original rows only

    # embedding-table gathers stay in XLA (data-dependent gather)
    flag_emb = jnp.take(params['feat_embed'], flag_p, axis=0)
    pos_emb = jnp.take(params['feat_embed'], pos_p, axis=0)

    tb = batch_tile
    h = embed(coord_p, params['coord_w'], flag_emb, pos_emb, tb=tb)      # (B, Np, 3*D)
    D3 = h.shape[-1]
    dkp = params['layers'][0]['wqkv'].shape[-1] // (3 * n_heads)

    scale = jnp.ones((1, D3), jnp.float32)    # identity affine ahead of the first layer
    shift = jnp.zeros((1, D3), jnp.float32)
    for lp in params['layers']:
        h, scale, shift = transformer_layer(h, scale, shift, lp, masks_p, valid, count,
                                            n_heads=n_heads, dkp=dkp, tb=tb,
                                            wdepth=_WEIGHT_BUF_DEPTH)

    tbt = 8 if B % 8 == 0 else B
    return classifier_tail(h, scale, shift, pm_p, params, tbt=tbt)       # (B, n_classes)


# ------------------------------------------------------------------------------ main
if __name__ == "__main__":
    # Small shapes consistent with the module (orig: B, 100, 2 / embed 256 / 8 heads).
    B, N = 2, 10                 # N not a multiple of 8 -> exercises the padding path
    coord_input_dim = 2
    feat_dict_size = 20
    n_layers = 2
    n_heads = 4
    embed_dim = 32               # transformer hidden width = 3*embed_dim = 96
    feedforward_dim = 64
    n_classes = 10

    key = jax.random.PRNGKey(0)
    kp, kc, kf, kpos, km = jax.random.split(key, 5)

    params = init_params(kp, coord_input_dim=coord_input_dim,
                         feat_dict_size=feat_dict_size, n_layers=n_layers,
                         n_heads=n_heads, embed_dim=embed_dim,
                         feedforward_dim=feedforward_dim, n_classes=n_classes)

    coord = jax.random.normal(kc, (B, N, coord_input_dim), jnp.float32)
    flag = jax.random.randint(kf, (B, N), 0, feat_dict_size)
    pos = jax.random.randint(kpos, (B, N), 0, feat_dict_size)

    # Additive attention masks: 0 = allowed, large negative = disallowed.
    def make_mask(k):
        bern = jax.random.bernoulli(k, 0.3, (B, N, N))
        m = jnp.where(bern, -1e9, 0.0).astype(jnp.float32)
        eye = jnp.eye(N, dtype=bool)[None]
        return jnp.where(eye, 0.0, m)      # keep diagonal so no row is fully masked

    km1, km2, km3 = jax.random.split(km, 3)
    masks = jnp.stack([make_mask(km1), make_mask(km2), make_mask(km3)], axis=0)

    padding_mask = jnp.ones((B, N, 1), jnp.float32).at[:, N - 2:, :].set(0.0)

    fwd = jax.jit(functools.partial(mgt_forward, n_heads=n_heads, batch_tile=1))
    logits = fwd(params, coord, flag, pos, masks, padding_mask)
    logits = jax.block_until_ready(logits)

    assert logits.shape == (B, n_classes)
    assert bool(jnp.all(jnp.isfinite(logits)))
    probs_sum = jnp.exp(logits).sum(axis=-1)
    assert bool(jnp.all(jnp.abs(probs_sum - 1.0) < 1e-3))
    print("KERNEL_OK")
</pallas_src>

<mosaic_0001>
module attributes {stable_mosaic.version = 11 : i64} {
  func.func @_embed_kernel(%arg0: i32, %arg1: memref<1x16x2xf32, #tpu.memory_space<vmem>>, %arg2: memref<2x32xf32, #tpu.memory_space<vmem>>, %arg3: memref<1x16x32xf32, #tpu.memory_space<vmem>>, %arg4: memref<1x16x32xf32, #tpu.memory_space<vmem>>, %arg5: memref<1x16x96xf32, #tpu.memory_space<vmem>>) attributes {dimension_semantics = [#tpu.dimension_semantics<parallel>], iteration_bounds = array<i64: 2>, scalar_prefetch = 0 : i64, scratch_operands = 0 : i64, tpu.core_type = #tpu.core_type<tc>, window_params = [{transform_indices = @transform_0, window_bounds = array<i64: 1, 16, 2>}, {pipeline_mode = #tpu.pipeline_mode<synchronous>, transform_indices = @transform_1, window_bounds = array<i64: 2, 32>}, {transform_indices = @transform_2, window_bounds = array<i64: 1, 16, 32>}, {transform_indices = @transform_3, window_bounds = array<i64: 1, 16, 32>}, {transform_indices = @transform_4, window_bounds = array<i64: 1, 16, 96>}]} {
    %c0 = arith.constant 0 : index
    %c0_0 = arith.constant 0 : index
    %c0_1 = arith.constant 0 : index
    %0 = vector.load %arg1[%c0, %c0_0, %c0_1] : memref<1x16x2xf32, #tpu.memory_space<vmem>>, vector<1x16x2xf32>
    %1 = vector.shape_cast %0 : vector<1x16x2xf32> to vector<16x2xf32>
    %c0_2 = arith.constant 0 : index
    %c0_3 = arith.constant 0 : index
    %2 = vector.load %arg2[%c0_2, %c0_3] : memref<2x32xf32, #tpu.memory_space<vmem>>, vector<2x32xf32>
    %cst = arith.constant dense<0.000000e+00> : vector<16x32xf32>
    %3 = tpu.matmul %1, %2, %cst {dimension_numbers = #tpu.dot_dimension_numbers<[1], [0], [0], [1], [0, 0, 1, 1], [], []>} : vector<16x2xf32>, vector<2x32xf32>, vector<16x32xf32> -> vector<16x32xf32>
    %4 = vector.shape_cast %3 : vector<16x32xf32> to vector<1x16x32xf32>
    %c0_4 = arith.constant 0 : index
    %c0_5 = arith.constant 0 : index
    %c0_6 = arith.constant 0 : index
    %5 = vector.load %arg3[%c0_4, %c0_5, %c0_6] : memref<1x16x32xf32, #tpu.memory_space<vmem>>, vector<1x16x32xf32>
    %c0_7 = arith.constant 0 : index
    %c0_8 = arith.constant 0 : index
    %c0_9 = arith.constant 0 : index
    %6 = vector.load %arg4[%c0_7, %c0_8, %c0_9] : memref<1x16x32xf32, #tpu.memory_space<vmem>>, vector<1x16x32xf32>
    %7 = tpu.concatenate %4, %5, %6 in 2 : vector<1x16x32xf32>, vector<1x16x32xf32>, vector<1x16x32xf32> -> vector<1x16x96xf32>
    %c0_10 = arith.constant 0 : index
    %c0_11 = arith.constant 0 : index
    %c0_12 = arith.constant 0 : index
    %8 = vector.load %arg5[%c0_10, %c0_11, %c0_12] : memref<1x16x96xf32, #tpu.memory_space<vmem>>, vector<1x16x96xf32>
    tpu.vector_store %arg5[%c0_10, %c0_11, %c0_12], %7 {strides = array<i32>} : memref<1x16x96xf32, #tpu.memory_space<vmem>>, vector<1x16x96xf32>,
    return
  }
  func.func @transform_0(%arg0: i32) -> (i32, i32, i32) {
    %c0_i32 = arith.constant 0 : i32
    %c0_i32_0 = arith.constant 0 : i32
    %c0_i32_1 = arith.constant 0 : i32
    return %arg0, %c0_i32, %c0_i32_0 : i32, i32, i32
  }
  func.func @transform_1(%arg0: i32) -> (i32, i32) {
    %c0_i32 = arith.constant 0 : i32
    %c0_i32_0 = arith.constant 0 : i32
    %c0_i32_1 = arith.constant 0 : i32
    return %c0_i32, %c0_i32_0 : i32, i32
  }
  func.func @transform_2(%arg0: i32) -> (i32, i32, i32) {
    %c0_i32 = arith.constant 0 : i32
    %c0_i32_0 = arith.constant 0 : i32
    %c0_i32_1 = arith.constant 0 : i32
    return %arg0, %c0_i32, %c0_i32_0 : i32, i32, i32
  }
  func.func @transform_3(%arg0: i32) -> (i32, i32, i32) {
    %c0_i32 = arith.constant 0 : i32
    %c0_i32_0 = arith.constant 0 : i32
    %c0_i32_1 = arith.constant 0 : i32
    return %arg0, %c0_i32, %c0_i32_0 : i32, i32, i32
  }
  func.func @transform_4(%arg0: i32) -> (i32, i32, i32) {
    %c0_i32 = arith.constant 0 : i32
    %c0_i32_0 = arith.constant 0 : i32
    %c0_i32_1 = arith.constant 0 : i32
    return %arg0, %c0_i32, %c0_i32_0 : i32, i32, i32
  }
}

module attributes {stable_mosaic.version = 11 : i64} {
  func.func @_attn_linear_kernel(%arg0: i32, %arg1: i32, %arg2: memref<1x96xf32, #tpu.memory_space<vmem>>, %arg3: memref<1x96xf32, #tpu.memory_space<vmem>>, %arg4: memref<1x16x96xf32, #tpu.memory_space<vmem>>, %arg5: memref<1x96x1536xbf16, #tpu.memory_space<vmem>>, %arg6: memref<1x512x96xbf16, #tpu.memory_space<vmem>>, %arg7: memref<1x1x16x16xbf16, #tpu.memory_space<vmem>>, %arg8: memref<1x96x96xbf16, #tpu.memory_space<vmem>>, %arg9: memref<1x96xf32, #tpu.memory_space<vmem>>, %arg10: memref<1x16x1xf32, #tpu.memory_space<vmem>>, %arg11: memref<1x16x96xf32, #tpu.memory_space<vmem>>, %arg12: memref<1x2x96xf32, #tpu.memory_space<vmem>>) attributes {dimension_semantics = [#tpu.dimension_semantics<parallel>, #tpu.dimension_semantics<arbitrary>], iteration_bounds = array<i64: 2, 3>, scalar_prefetch = 0 : i64, scratch_operands = 0 : i64, tpu.core_type = #tpu.core_type<tc>, window_params = [{pipeline_mode = #tpu.pipeline_mode<synchronous>, transform_indices = @transform_0, window_bounds = array<i64: 1, 96>}, {pipeline_mode = #tpu.pipeline_mode<synchronous>, transform_indices = @transform_1, window_bounds = array<i64: 1, 96>}, {transform_indices = @transform_2, window_bounds = array<i64: 1, 16, 96>}, {transform_indices = @transform_3, window_bounds = array<i64: 1, 96, 1536>}, {transform_indices = @transform_4, window_bounds = array<i64: 1, 512, 96>}, {transform_indices = @transform_5, window_bounds = array<i64: 1, 1, 16, 16>}, {transform_indices = @transform_6, window_bounds = array<i64: 1, 96, 96>}, {pipeline_mode = #tpu.pipeline_mode<synchronous>, transform_indices = @transform_7, window_bounds = array<i64: 1, 96>}, {transform_indices = @transform_8, window_bounds = array<i64: 1, 16, 1>}, {transform_indices = @transform_9, window_bounds = array<i64: 1, 16, 96>}, {transform_indices = @transform_10, window_bounds = array<i64: 1, 2, 96>}]} {
    %c0 = arith.constant 0 : index
    %c0_0 = arith.constant 0 : index
    %c0_1 = arith.constant 0 : index
    %0 = vector.load %arg4[%c0, %c0_0, %c0_1] : memref<1x16x96xf32, #tpu.memory_space<vmem>>, vector<1x16x96xf32>
    %c0_2 = arith.constant 0 : index
    %c0_3 = arith.constant 0 : index
    %1 = vector.load %arg2[%c0_2, %c0_3] : memref<1x96xf32, #tpu.memory_space<vmem>>, vector<1x96xf32>
    %2 = vector.shape_cast %1 : vector<1x96xf32> to vector<1x1x96xf32>
    %3 = vector.broadcast %2 : vector<1x1x96xf32> to vector<1x16x96xf32>
    %4 = arith.mulf %0, %3 : vector<1x16x96xf32>
    %c0_4 = arith.constant 0 : index
    %c0_5 = arith.constant 0 : index
    %5 = vector.load %arg3[%c0_4, %c0_5] : memref<1x96xf32, #tpu.memory_space<vmem>>, vector<1x96xf32>
    %6 = vector.shape_cast %5 : vector<1x96xf32> to vector<1x1x96xf32>
    %7 = vector.broadcast %6 : vector<1x1x96xf32> to vector<1x16x96xf32>
    %8 = arith.addf %4, %7 : vector<1x16x96xf32>
    %9 = vector.shape_cast %8 : vector<1x16x96xf32> to vector<16x96xf32>
    %10 = arith.truncf %9 : vector<16x96xf32> to vector<16x96xbf16>
    %c0_6 = arith.constant 0 : index
    %c0_7 = arith.constant 0 : index
    %c0_8 = arith.constant 0 : index
    %11 = vector.load %arg5[%c0_6, %c0_7, %c0_8] : memref<1x96x1536xbf16, #tpu.memory_space<vmem>>, vector<1x96x1536xbf16>
    %12 = vector.shape_cast %11 : vector<1x96x1536xbf16> to vector<96x1536xbf16>
    %cst = arith.constant dense<0.000000e+00> : vector<16x1536xf32>
    %13 = tpu.matmul %10, %12, %cst {dimension_numbers = #tpu.dot_dimension_numbers<[1], [0], [0], [1], [0, 0, 1, 1], [], []>} : vector<16x96xbf16>, vector<96x1536xbf16>, vector<16x1536xf32> -> vector<16x1536xf32>
    %c0_9 = arith.constant 0 : index
    %c0_10 = arith.constant 0 : index
    %c0_11 = arith.constant 0 : index
    %c0_12 = arith.constant 0 : index
    %14 = vector.load %arg7[%c0_9, %c0_10, %c0_11, %c0_12] : memref<1x1x16x16xbf16, #tpu.memory_space<vmem>>, vector<1x1x16x16xbf16>
    %15 = vector.shape_cast %14 : vector<1x1x16x16xbf16> to vector<1x16x16xbf16>
    %16 = arith.extf %15 : vector<1x16x16xbf16> to vector<1x16x16xf32>
    %17 = vector.extract_strided_slice %13 {offsets = [0, 0], sizes = [16, 128], strides = [1, 1]} : vector<16x1536xf32> to vector<16x128xf32>
    %18 = vector.shape_cast %17 : vector<16x128xf32> to vector<1x16x128xf32>
    %19 = arith.truncf %18 : vector<1x16x128xf32> to vector<1x16x128xbf16>
    %20 = vector.extract_strided_slice %13 {offsets = [0, 512], sizes = [16, 128], strides = [1, 1]} : vector<16x1536xf32> to vector<16x128xf32>
    %21 = vector.shape_cast %20 : vector<16x128xf32> to vector<1x16x128xf32>
    %22 = arith.truncf %21 : vector<1x16x128xf32> to vector<1x16x128xbf16>
    %23 = vector.extract_strided_slice %13 {offsets = [0, 1024], sizes = [16, 128], strides = [1, 1]} : vector<16x1536xf32> to vector<16x128xf32>
    %24 = vector.shape_cast %23 : vector<16x128xf32> to vector<1x16x128xf32>
    %25 = arith.truncf %24 : vector<1x16x128xf32> to vector<1x16x128xbf16>
    "tpu.trace_start"() <{level = 10 : i32, message = "bqd,bkd->bqk"}> : () -> ()
    %cst_13 = arith.constant dense<0.000000e+00> : vector<1x16x16xf32>
    %26 = tpu.matmul %19, %22, %cst_13 {dimension_numbers = #tpu.dot_dimension_numbers<[2], [2], [1], [1], [0, 0, 0, 1, 1, 1], [0], [0]>} : vector<1x16x128xbf16>, vector<1x16x128xbf16>, vector<1x16x16xf32> -> vector<1x16x16xf32>
    "tpu.trace_stop"() : () -> ()
    %27 = arith.addf %26, %16 : vector<1x16x16xf32>
    %cst_14 = arith.constant dense<0xFF800000> : vector<1x16xf32>
    %28 = vector.multi_reduction <maximumf>, %27, %cst_14 [2] : vector<1x16x16xf32> to vector<1x16xf32>
    %29 = vector.shape_cast %28 : vector<1x16xf32> to vector<1x16x1xf32>
    %30 = vector.broadcast %29 : vector<1x16x1xf32> to vector<1x16x16xf32>
    %31 = arith.subf %27, %30 : vector<1x16x16xf32>
    %32 = math.exp %31 : vector<1x16x16xf32>
    %cst_15 = arith.constant dense<0.000000e+00> : vector<1x16xf32>
    %33 = vector.multi_reduction <add>, %32, %cst_15 [2] : vector<1x16x16xf32> to vector<1x16xf32>
    %34 = vector.shape_cast %33 : vector<1x16xf32> to vector<1x16x1xf32>
    %35 = tpu.reciprocal %34 {approx = true} : vector<1x16x1xf32> -> vector<1x16x1xf32>
    %36 = vector.broadcast %35 : vector<1x16x1xf32> to vector<1x16x16xf32>
    %37 = arith.mulf %32, %36 : vector<1x16x16xf32>
    %38 = arith.truncf %37 : vector<1x16x16xf32> to vector<1x16x16xbf16>
    "tpu.trace_start"() <{level = 10 : i32, message = "bqk,bkd->bqd"}> : () -> ()
    %cst_16 = arith.constant dense<0.000000e+00> : vector<1x16x128xf32>
    %39 = tpu.matmul %38, %25, %cst_16 {dimension_numbers = #tpu.dot_dimension_numbers<[2], [1], [1], [2], [0, 0, 0, 1, 1, 2], [0], [0]>} : vector<1x16x16xbf16>, vector<1x16x128xbf16>, vector<1x16x128xf32> -> vector<1x16x128xf32>
    "tpu.trace_stop"() : () -> ()
    %40 = vector.extract_strided_slice %13 {offsets = [0, 128], sizes = [16, 128], strides = [1, 1]} : vector<16x1536xf32> to vector<16x128xf32>
    %41 = vector.shape_cast %40 : vector<16x128xf32> to vector<1x16x128xf32>
    %42 = arith.truncf %41 : vector<1x16x128xf32> to vector<1x16x128xbf16>
    %43 = vector.extract_strided_slice %13 {offsets = [0, 640], sizes = [16, 128], strides = [1, 1]} : vector<16x1536xf32> to vector<16x128xf32>
    %44 = vector.shape_cast %43 : vector<16x128xf32> to vector<1x16x128xf32>
    %45 = arith.truncf %44 : vector<1x16x128xf32> to vector<1x16x128xbf16>
    %46 = vector.extract_strided_slice %13 {offsets = [0, 1152], sizes = [16, 128], strides = [1, 1]} : vector<16x1536xf32> to vector<16x128xf32>
    %47 = vector.shape_cast %46 : vector<16x128xf32> to vector<1x16x128xf32>
    %48 = arith.truncf %47 : vector<1x16x128xf32> to vector<1x16x128xbf16>
    "tpu.trace_start"() <{level = 10 : i32, message = "bqd,bkd->bqk"}> : () -> ()
    %cst_17 = arith.constant dense<0.000000e+00> : vector<1x16x16xf32>
    %49 = tpu.matmul %42, %45, %cst_17 {dimension_numbers = #tpu.dot_dimension_numbers<[2], [2], [1], [1], [0, 0, 0, 1, 1, 1], [0], [0]>} : vector<1x16x128xbf16>, vector<1x16x128xbf16>, vector<1x16x16xf32> -> vector<1x16x16xf32>
    "tpu.trace_stop"() : () -> ()
    %50 = arith.addf %49, %16 : vector<1x16x16xf32>
    %cst_18 = arith.constant dense<0xFF800000> : vector<1x16xf32>
    %51 = vector.multi_reduction <maximumf>, %50, %cst_18 [2] : vector<1x16x16xf32> to vector<1x16xf32>
    %52 = vector.shape_cast %51 : vector<1x16xf32> to vector<1x16x1xf32>
    %53 = vector.broadcast %52 : vector<1x16x1xf32> to vector<1x16x16xf32>
    %54 = arith.subf %50, %53 : vector<1x16x16xf32>
    %55 = math.exp %54 : vector<1x16x16xf32>
    %cst_19 = arith.constant dense<0.000000e+00> : vector<1x16xf32>
    %56 = vector.multi_reduction <add>, %55, %cst_19 [2] : vector<1x16x16xf32> to vector<1x16xf32>
    %57 = vector.shape_cast %56 : vector<1x16xf32> to vector<1x16x1xf32>
    %58 = tpu.reciprocal %57 {approx = true} : vector<1x16x1xf32> -> vector<1x16x1xf32>
    %59 = vector.broadcast %58 : vector<1x16x1xf32> to vector<1x16x16xf32>
    %60 = arith.mulf %55, %59 : vector<1x16x16xf32>
    %61 = arith.truncf %60 : vector<1x16x16xf32> to vector<1x16x16xbf16>
    "tpu.trace_start"() <{level = 10 : i32, message = "bqk,bkd->bqd"}> : () -> ()
    %cst_20 = arith.constant dense<0.000000e+00> : vector<1x16x128xf32>
    %62 = tpu.matmul %61, %48, %cst_20 {dimension_numbers = #tpu.dot_dimension_numbers<[2], [1], [1], [2], [0, 0, 0, 1, 1, 2], [0], [0]>} : vector<1x16x16xbf16>, vector<1x16x128xbf16>, vector<1x16x128xf32> -> vector<1x16x128xf32>
    "tpu.trace_stop"() : () -> ()
    %63 = vector.extract_strided_slice %13 {offsets = [0, 256], sizes = [16, 128], strides = [1, 1]} : vector<16x1536xf32> to vector<16x128xf32>
    %64 = vector.shape_cast %63 : vector<16x128xf32> to vector<1x16x128xf32>
    %65 = arith.truncf %64 : vector<1x16x128xf32> to vector<1x16x128xbf16>
    %66 = vector.extract_strided_slice %13 {offsets = [0, 768], sizes = [16, 128], strides = [1, 1]} : vector<16x1536xf32> to vector<16x128xf32>
    %67 = vector.shape_cast %66 : vector<16x128xf32> to vector<1x16x128xf32>
    %68 = arith.truncf %67 : vector<1x16x128xf32> to vector<1x16x128xbf16>
    %69 = vector.extract_strided_slice %13 {offsets = [0, 1280], sizes = [16, 128], strides = [1, 1]} : vector<16x1536xf32> to vector<16x128xf32>
    %70 = vector.shape_cast %69 : vector<16x128xf32> to vector<1x16x128xf32>
    %71 = arith.truncf %70 : vector<1x16x128xf32> to vector<1x16x128xbf16>
    "tpu.trace_start"() <{level = 10 : i32, message = "bqd,bkd->bqk"}> : () -> ()
    %cst_21 = arith.constant dense<0.000000e+00> : vector<1x16x16xf32>
    %72 = tpu.matmul %65, %68, %cst_21 {dimension_numbers = #tpu.dot_dimension_numbers<[2], [2], [1], [1], [0, 0, 0, 1, 1, 1], [0], [0]>} : vector<1x16x128xbf16>, vector<1x16x128xbf16>, vector<1x16x16xf32> -> vector<1x16x16xf32>
    "tpu.trace_stop"() : () -> ()
    %73 = arith.addf %72, %16 : vector<1x16x16xf32>
    %cst_22 = arith.constant dense<0xFF800000> : vector<1x16xf32>
    %74 = vector.multi_reduction <maximumf>, %73, %cst_22 [2] : vector<1x16x16xf32> to vector<1x16xf32>
    %75 = vector.shape_cast %74 : vector<1x16xf32> to vector<1x16x1xf32>
    %76 = vector.broadcast %75 : vector<1x16x1xf32> to vector<1x16x16xf32>
    %77 = arith.subf %73, %76 : vector<1x16x16xf32>
    %78 = math.exp %77 : vector<1x16x16xf32>
    %cst_23 = arith.constant dense<0.000000e+00> : vector<1x16xf32>
    %79 = vector.multi_reduction <add>, %78, %cst_23 [2] : vector<1x16x16xf32> to vector<1x16xf32>
    %80 = vector.shape_cast %79 : vector<1x16xf32> to vector<1x16x1xf32>
    %81 = tpu.reciprocal %80 {approx = true} : vector<1x16x1xf32> -> vector<1x16x1xf32>
    %82 = vector.broadcast %81 : vector<1x16x1xf32> to vector<1x16x16xf32>
    %83 = arith.mulf %78, %82 : vector<1x16x16xf32>
    %84 = arith.truncf %83 : vector<1x16x16xf32> to vector<1x16x16xbf16>
    "tpu.trace_start"() <{level = 10 : i32, message = "bqk,bkd->bqd"}> : () -> ()
    %cst_24 = arith.constant dense<0.000000e+00> : vector<1x16x128xf32>
    %85 = tpu.matmul %84, %71, %cst_24 {dimension_numbers = #tpu.dot_dimension_numbers<[2], [1], [1], [2], [0, 0, 0, 1, 1, 2], [0], [0]>} : vector<1x16x16xbf16>, vector<1x16x128xbf16>, vector<1x16x128xf32> -> vector<1x16x128xf32>
    "tpu.trace_stop"() : () -> ()
    %86 = vector.extract_strided_slice %13 {offsets = [0, 384], sizes = [16, 128], strides = [1, 1]} : vector<16x1536xf32> to vector<16x128xf32>
    %87 = vector.shape_cast %86 : vector<16x128xf32> to vector<1x16x128xf32>
    %88 = arith.truncf %87 : vector<1x16x128xf32> to vector<1x16x128xbf16>
    %89 = vector.extract_strided_slice %13 {offsets = [0, 896], sizes = [16, 128], strides = [1, 1]} : vector<16x1536xf32> to vector<16x128xf32>
    %90 = vector.shape_cast %89 : vector<16x128xf32> to vector<1x16x128xf32>
    %91 = arith.truncf %90 : vector<1x16x128xf32> to vector<1x16x128xbf16>
    %92 = vector.extract_strided_slice %13 {offsets = [0, 1408], sizes = [16, 128], strides = [1, 1]} : vector<16x1536xf32> to vector<16x128xf32>
    %93 = vector.shape_cast %92 : vector<16x128xf32> to vector<1x16x128xf32>
    %94 = arith.truncf %93 : vector<1x16x128xf32> to vector<1x16x128xbf16>
    "tpu.trace_start"() <{level = 10 : i32, message = "bqd,bkd->bqk"}> : () -> ()
    %cst_25 = arith.constant dense<0.000000e+00> : vector<1x16x16xf32>
    %95 = tpu.matmul %88, %91, %cst_25 {dimension_numbers = #tpu.dot_dimension_numbers<[2], [2], [1], [1], [0, 0, 0, 1, 1, 1], [0], [0]>} : vector<1x16x128xbf16>, vector<1x16x128xbf16>, vector<1x16x16xf32> -> vector<1x16x16xf32>
    "tpu.trace_stop"() : () -> ()
    %96 = arith.addf %95, %16 : vector<1x16x16xf32>
    %cst_26 = arith.constant dense<0xFF800000> : vector<1x16xf32>
    %97 = vector.multi_reduction <maximumf>, %96, %cst_26 [2] : vector<1x16x16xf32> to vector<1x16xf32>
    %98 = vector.shape_cast %97 : vector<1x16xf32> to vector<1x16x1xf32>
    %99 = vector.broadcast %98 : vector<1x16x1xf32> to vector<1x16x16xf32>
    %100 = arith.subf %96, %99 : vector<1x16x16xf32>
    %101 = math.exp %100 : vector<1x16x16xf32>
    %cst_27 = arith.constant dense<0.000000e+00> : vector<1x16xf32>
    %102 = vector.multi_reduction <add>, %101, %cst_27 [2] : vector<1x16x16xf32> to vector<1x16xf32>
    %103 = vector.shape_cast %102 : vector<1x16xf32> to vector<1x16x1xf32>
    %104 = tpu.reciprocal %103 {approx = true} : vector<1x16x1xf32> -> vector<1x16x1xf32>
    %105 = vector.broadcast %104 : vector<1x16x1xf32> to vector<1x16x16xf32>
    %106 = arith.mulf %101, %105 : vector<1x16x16xf32>
    %107 = arith.truncf %106 : vector<1x16x16xf32> to vector<1x16x16xbf16>
    "tpu.trace_start"() <{level = 10 : i32, message = "bqk,bkd->bqd"}> : () -> ()
    %cst_28 = arith.constant dense<0.000000e+00> : vector<1x16x128xf32>
    %108 = tpu.matmul %107, %94, %cst_28 {dimension_numbers = #tpu.dot_dimension_numbers<[2], [1], [1], [2], [0, 0, 0, 1, 1, 2], [0], [0]>} : vector<1x16x16xbf16>, vector<1x16x128xbf16>, vector<1x16x128xf32> -> vector<1x16x128xf32>
    "tpu.trace_stop"() : () -> ()
    %109 = tpu.concatenate %39, %62, %85, %108 in 2 : vector<1x16x128xf32>, vector<1x16x128xf32>, vector<1x16x128xf32>, vector<1x16x128xf32> -> vector<1x16x512xf32>
    %110 = vector.shape_cast %109 : vector<1x16x512xf32> to vector<16x512xf32>
    %111 = arith.truncf %110 : vector<16x512xf32> to vector<16x512xbf16>
    %c0_29 = arith.constant 0 : index
    %c0_30 = arith.constant 0 : index
    %c0_31 = arith.constant 0 : index
    %112 = vector.load %arg6[%c0_29, %c0_30, %c0_31] : memref<1x512x96xbf16, #tpu.memory_space<vmem>>, vector<1x512x96xbf16>
    %113 = vector.shape_cast %112 : vector<1x512x96xbf16> to vector<512x96xbf16>
    %cst_32 = arith.constant dense<0.000000e+00> : vector<16x96xf32>
    %114 = tpu.matmul %111, %113, %cst_32 {dimension_numbers = #tpu.dot_dimension_numbers<[1], [0], [0], [1], [0, 0, 1, 1], [], []>} : vector<16x512xbf16>, vector<512x96xbf16>, vector<16x96xf32> -> vector<16x96xf32>
    %115 = arith.addf %9, %114 : vector<16x96xf32>
    %116 = arith.truncf %115 : vector<16x96xf32> to vector<16x96xbf16>
    %c0_33 = arith.constant 0 : index
    %c0_34 = arith.constant 0 : index
    %c0_35 = arith.constant 0 : index
    %117 = vector.load %arg8[%c0_33, %c0_34, %c0_35] : memref<1x96x96xbf16, #tpu.memory_space<vmem>>, vector<1x96x96xbf16>
    %118 = vector.shape_cast %117 : vector<1x96x96xbf16> to vector<96x96xbf16>
    %cst_36 = arith.constant dense<0.000000e+00> : vector<16x96xf32>
    %119 = tpu.matmul %116, %118, %cst_36 {dimension_numbers = #tpu.dot_dimension_numbers<[1], [0], [0], [1], [0, 0, 1, 1], [], []>} : vector<16x96xbf16>, vector<96x96xbf16>, vector<16x96xf32> -> vector<16x96xf32>
    %120 = vector.shape_cast %119 : vector<16x96xf32> to vector<1x16x96xf32>
    %c0_i32 = arith.constant 0 : i32
    %121 = arith.cmpi eq, %arg1, %c0_i32 : i32
    %122 = arith.extui %121 : i1 to i32
    %c0_i32_37 = arith.constant 0 : i32
    %123 = arith.cmpi ne, %122, %c0_i32_37 : i32
    scf.if %123 {
      %c0_41 = arith.constant 0 : index
      %c0_42 = arith.constant 0 : index
      %c0_43 = arith.constant 0 : index
      %130 = vector.load %arg11[%c0_41, %c0_42, %c0_43] : memref<1x16x96xf32, #tpu.memory_space<vmem>>, vector<1x16x96xf32>
      tpu.vector_store %arg11[%c0_41, %c0_42, %c0_43], %120 {strides = array<i32>} : memref<1x16x96xf32, #tpu.memory_space<vmem>>, vector<1x16x96xf32>,
    } else {
    }
    %c0_i32_38 = arith.constant 0 : i32
    %124 = arith.cmpi ne, %arg1, %c0_i32_38 : i32
    %125 = arith.extui %124 : i1 to i32
    %c0_i32_39 = arith.constant 0 : i32
    %126 = arith.cmpi ne, %125, %c0_i32_39 : i32
    scf.if %126 {
      %c0_41 = arith.constant 0 : index
      %c0_42 = arith.constant 0 : index
      %c0_43 = arith.constant 0 : index
      %130 = vector.load %arg11[%c0_41, %c0_42, %c0_43] : memref<1x16x96xf32, #tpu.memory_space<vmem>>, vector<1x16x96xf32>
      %131 = arith.addf %130, %120 : vector<1x16x96xf32>
      %c0_44 = arith.constant 0 : index
      %c0_45 = arith.constant 0 : index
      %c0_46 = arith.constant 0 : index
      %132 = vector.load %arg11[%c0_44, %c0_45, %c0_46] : memref<1x16x96xf32, #tpu.memory_space<vmem>>, vector<1x16x96xf32>
      tpu.vector_store %arg11[%c0_44, %c0_45, %c0_46], %131 {strides = array<i32>} : memref<1x16x96xf32, #tpu.memory_space<vmem>>, vector<1x16x96xf32>,
    } else {
    }
    %c2_i32 = arith.constant 2 : i32
    %127 = arith.cmpi eq, %arg1, %c2_i32 : i32
    %128 = arith.extui %127 : i1 to i32
    %c0_i32_40 = arith.constant 0 : i32
    %129 = arith.cmpi ne, %128, %c0_i32_40 : i32
    scf.if %129 {
      %c0_41 = arith.constant 0 : index
      %c0_42 = arith.constant 0 : index
      %c0_43 = arith.constant 0 : index
      %130 = vector.load %arg11[%c0_41, %c0_42, %c0_43] : memref<1x16x96xf32, #tpu.memory_space<vmem>>, vector<1x16x96xf32>
      %c0_44 = arith.constant 0 : index
      %c0_45 = arith.constant 0 : index
      %131 = vector.load %arg9[%c0_44, %c0_45] : memref<1x96xf32, #tpu.memory_space<vmem>>, vector<1x96xf32>
      %132 = vector.shape_cast %131 : vector<1x96xf32> to vector<1x1x96xf32>
      %133 = vector.broadcast %132 : vector<1x1x96xf32> to vector<1x16x96xf32>
      %134 = arith.addf %130, %133 : vector<1x16x96xf32>
      %cst_46 = arith.constant 0.000000e+00 : f32
      %135 = vector.broadcast %cst_46 : f32 to vector<1x16x96xf32>
      %136 = arith.maximumf %134, %135 : vector<1x16x96xf32>
      %c0_47 = arith.constant 0 : index
      %c0_48 = arith.constant 0 : index
      %c0_49 = arith.constant 0 : index
      %137 = vector.load %arg11[%c0_47, %c0_48, %c0_49] : memref<1x16x96xf32, #tpu.memory_space<vmem>>, vector<1x16x96xf32>
      tpu.vector_store %arg11[%c0_47, %c0_48, %c0_49], %136 {strides = array<i32>} : memref<1x16x96xf32, #tpu.memory_space<vmem>>, vector<1x16x96xf32>,
      %c0_50 = arith.constant 0 : index
      %c0_51 = arith.constant 0 : index
      %c0_52 = arith.constant 0 : index
      %138 = vector.load %arg10[%c0_50, %c0_51, %c0_52] : memref<1x16x1xf32, #tpu.memory_space<vmem>>, vector<1x16x1xf32>
      %139 = vector.broadcast %138 : vector<1x16x1xf32> to vector<1x16x96xf32>
      %140 = arith.mulf %136, %139 : vector<1x16x96xf32>
      %141 = vector.shape_cast %140 : vector<1x16x96xf32> to vector<16x96xf32>
      %cst_53 = arith.constant dense<0.000000e+00> : vector<96xf32>
      %142 = vector.multi_reduction <add>, %141, %cst_53 [0] : vector<16x96xf32> to vector<96xf32>
      %143 = vector.shape_cast %142 : vector<96xf32> to vector<1x96xf32>
      %144 = vector.shape_cast %136 : vector<1x16x96xf32> to vector<16x96xf32>
      %145 = arith.mulf %141, %144 : vector<16x96xf32>
      %cst_54 = arith.constant dense<0.000000e+00> : vector<96xf32>
      %146 = vector.multi_reduction <add>, %145, %cst_54 [0] : vector<16x96xf32> to vector<96xf32>
      %147 = vector.shape_cast %146 : vector<96xf32> to vector<1x96xf32>
      %148 = tpu.concatenate %143, %147 in 0 : vector<1x96xf32>, vector<1x96xf32> -> vector<2x96xf32>
      %149 = vector.shape_cast %148 : vector<2x96xf32> to vector<1x2x96xf32>
      %c0_55 = arith.constant 0 : index
      %c0_56 = arith.constant 0 : index
      %c0_57 = arith.constant 0 : index
      %150 = vector.load %arg12[%c0_55, %c0_56, %c0_57] : memref<1x2x96xf32, #tpu.memory_space<vmem>>, vector<1x2x96xf32>
      tpu.vector_store %arg12[%c0_55, %c0_56, %c0_57], %149 {strides = array<i32>} : memref<1x2x96xf32, #tpu.memory_space<vmem>>, vector<1x2x96xf32>,
    } else {
    }
    return
  }
  func.func @transform_0(%arg0: i32, %arg1: i32) -> (i32, i32) {
    %c0_i32 = arith.constant 0 : i32
    %c0_i32_0 = arith.constant 0 : i32
    %c0_i32_1 = arith.constant 0 : i32
    return %c0_i32, %c0_i32_0 : i32, i32
  }
  func.func @transform_1(%arg0: i32, %arg1: i32) -> (i32, i32) {
    %c0_i32 = arith.constant 0 : i32
    %c0_i32_0 = arith.constant 0 : i32
    %c0_i32_1 = arith.constant 0 : i32
    return %c0_i32, %c0_i32_0 : i32, i32
  }
  func.func @transform_2(%arg0: i32, %arg1: i32) -> (i32, i32, i32) {
    %c0_i32 = arith.constant 0 : i32
    %c0_i32_0 = arith.constant 0 : i32
    %c0_i32_1 = arith.constant 0 : i32
    return %arg0, %c0_i32, %c0_i32_0 : i32, i32, i32
  }
  func.func @transform_3(%arg0: i32, %arg1: i32) -> (i32, i32, i32) {
    %c0_i32 = arith.constant 0 : i32
    %c0_i32_0 = arith.constant 0 : i32
    %c0_i32_1 = arith.constant 0 : i32
    return %arg1, %c0_i32, %c0_i32_0 : i32, i32, i32
  }
  func.func @transform_4(%arg0: i32, %arg1: i32) -> (i32, i32, i32) {
    %c0_i32 = arith.constant 0 : i32
    %c0_i32_0 = arith.constant 0 : i32
    %c0_i32_1 = arith.constant 0 : i32
    return %arg1, %c0_i32, %c0_i32_0 : i32, i32, i32
  }
  func.func @transform_5(%arg0: i32, %arg1: i32) -> (i32, i32, i32, i32) {
    %c0_i32 = arith.constant 0 : i32
    %c0_i32_0 = arith.constant 0 : i32
    %c0_i32_1 = arith.constant 0 : i32
    return %arg1, %arg0, %c0_i32, %c0_i32_0 : i32, i32, i32, i32
  }
  func.func @transform_6(%arg0: i32, %arg1: i32) -> (i32, i32, i32) {
    %c0_i32 = arith.constant 0 : i32
    %c0_i32_0 = arith.constant 0 : i32
    %c0_i32_1 = arith.constant 0 : i32
    return %arg1, %c0_i32, %c0_i32_0 : i32, i32, i32
  }
  func.func @transform_7(%arg0: i32, %arg1: i32) -> (i32, i32) {
    %c0_i32 = arith.constant 0 : i32
    %c0_i32_0 = arith.constant 0 : i32
    %c0_i32_1 = arith.constant 0 : i32
    return %c0_i32, %c0_i32_0 : i32, i32
  }
  func.func @transform_8(%arg0: i32, %arg1: i32) -> (i32, i32, i32) {
    %c0_i32 = arith.constant 0 : i32
    %c0_i32_0 = arith.constant 0 : i32
    %c0_i32_1 = arith.constant 0 : i32
    return %arg0, %c0_i32, %c0_i32_0 : i32, i32, i32
  }
  func.func @transform_9(%arg0: i32, %arg1: i32) -> (i32, i32, i32) {
    %c0_i32 = arith.constant 0 : i32
    %c0_i32_0 = arith.constant 0 : i32
    %c0_i32_1 = arith.constant 0 : i32
    return %arg0, %c0_i32, %c0_i32_0 : i32, i32, i32
  }
  func.func @transform_10(%arg0: i32, %arg1: i32) -> (i32, i32, i32) {
    %c0_i32 = arith.constant 0 : i32
    %c0_i32_0 = arith.constant 0 : i32
    %c0_i32_1 = arith.constant 0 : i32
    return %arg0, %c0_i32, %c0_i32_0 : i32, i32, i32
  }
}

module attributes {stable_mosaic.version = 11 : i64} {
  func.func @_bn_ff_kernel(%arg0: i32, %arg1: memref<1x16x96xf32, #tpu.memory_space<vmem>>, %arg2: memref<1x96xf32, #tpu.memory_space<vmem>>, %arg3: memref<1x96xf32, #tpu.memory_space<vmem>>, %arg4: memref<96x96xbf16, #tpu.memory_space<vmem>>, %arg5: memref<1x96xf32, #tpu.memory_space<vmem>>, %arg6: memref<1x16x1xf32, #tpu.memory_space<vmem>>, %arg7: memref<1x16x96xf32, #tpu.memory_space<vmem>>, %arg8: memref<1x2x96xf32, #tpu.memory_space<vmem>>) attributes {dimension_semantics = [#tpu.dimension_semantics<parallel>], iteration_bounds = array<i64: 2>, scalar_prefetch = 0 : i64, scratch_operands = 0 : i64, tpu.core_type = #tpu.core_type<tc>, window_params = [{transform_indices = @transform_0, window_bounds = array<i64: 1, 16, 96>}, {pipeline_mode = #tpu.pipeline_mode<synchronous>, transform_indices = @transform_1, window_bounds = array<i64: 1, 96>}, {pipeline_mode = #tpu.pipeline_mode<synchronous>, transform_indices = @transform_2, window_bounds = array<i64: 1, 96>}, {pipeline_mode = #tpu.pipeline_mode<synchronous>, transform_indices = @transform_3, window_bounds = array<i64: 96, 96>}, {pipeline_mode = #tpu.pipeline_mode<synchronous>, transform_indices = @transform_4, window_bounds = array<i64: 1, 96>}, {transform_indices = @transform_5, window_bounds = array<i64: 1, 16, 1>}, {transform_indices = @transform_6, window_bounds = array<i64: 1, 16, 96>}, {transform_indices = @transform_7, window_bounds = array<i64: 1, 2, 96>}]} {
    %c0 = arith.constant 0 : index
    %c0_0 = arith.constant 0 : index
    %c0_1 = arith.constant 0 : index
    %0 = vector.load %arg1[%c0, %c0_0, %c0_1] : memref<1x16x96xf32, #tpu.memory_space<vmem>>, vector<1x16x96xf32>
    %c0_2 = arith.constant 0 : index
    %c0_3 = arith.constant 0 : index
    %1 = vector.load %arg2[%c0_2, %c0_3] : memref<1x96xf32, #tpu.memory_space<vmem>>, vector<1x96xf32>
    %2 = vector.shape_cast %1 : vector<1x96xf32> to vector<1x1x96xf32>
    %3 = vector.broadcast %2 : vector<1x1x96xf32> to vector<1x16x96xf32>
    %4 = arith.mulf %0, %3 : vector<1x16x96xf32>
    %c0_4 = arith.constant 0 : index
    %c0_5 = arith.constant 0 : index
    %5 = vector.load %arg3[%c0_4, %c0_5] : memref<1x96xf32, #tpu.memory_space<vmem>>, vector<1x96xf32>
    %6 = vector.shape_cast %5 : vector<1x96xf32> to vector<1x1x96xf32>
    %7 = vector.broadcast %6 : vector<1x1x96xf32> to vector<1x16x96xf32>
    %8 = arith.addf %4, %7 : vector<1x16x96xf32>
    %9 = vector.shape_cast %8 : vector<1x16x96xf32> to vector<16x96xf32>
    %10 = arith.truncf %9 : vector<16x96xf32> to vector<16x96xbf16>
    %c0_6 = arith.constant 0 : index
    %c0_7 = arith.constant 0 : index
    %11 = vector.load %arg4[%c0_6, %c0_7] : memref<96x96xbf16, #tpu.memory_space<vmem>>, vector<96x96xbf16>
    %cst = arith.constant dense<0.000000e+00> : vector<16x96xf32>
    %12 = tpu.matmul %10, %11, %cst {dimension_numbers = #tpu.dot_dimension_numbers<[1], [0], [0], [1], [0, 0, 1, 1], [], []>} : vector<16x96xbf16>, vector<96x96xbf16>, vector<16x96xf32> -> vector<16x96xf32>
    %c0_8 = arith.constant 0 : index
    %c0_9 = arith.constant 0 : index
    %13 = vector.load %arg5[%c0_8, %c0_9] : memref<1x96xf32, #tpu.memory_space<vmem>>, vector<1x96xf32>
    %14 = vector.broadcast %13 : vector<1x96xf32> to vector<16x96xf32>
    %15 = arith.addf %12, %14 : vector<16x96xf32>
    %cst_10 = arith.constant 0.000000e+00 : f32
    %16 = vector.broadcast %cst_10 : f32 to vector<16x96xf32>
    %17 = arith.maximumf %15, %16 : vector<16x96xf32>
    %18 = arith.addf %9, %17 : vector<16x96xf32>
    %c0_11 = arith.constant 0 : index
    %c0_12 = arith.constant 0 : index
    %c0_13 = arith.constant 0 : index
    %19 = vector.load %arg6[%c0_11, %c0_12, %c0_13] : memref<1x16x1xf32, #tpu.memory_space<vmem>>, vector<1x16x1xf32>
    %20 = vector.shape_cast %19 : vector<1x16x1xf32> to vector<16x1xf32>
    %21 = vector.broadcast %20 : vector<16x1xf32> to vector<16x96xf32>
    %22 = arith.mulf %18, %21 : vector<16x96xf32>
    %cst_14 = arith.constant dense<0.000000e+00> : vector<96xf32>
    %23 = vector.multi_reduction <add>, %22, %cst_14 [0] : vector<16x96xf32> to vector<96xf32>
    %24 = vector.shape_cast %23 : vector<96xf32> to vector<1x96xf32>
    %25 = arith.mulf %22, %18 : vector<16x96xf32>
    %cst_15 = arith.constant dense<0.000000e+00> : vector<96xf32>
    %26 = vector.multi_reduction <add>, %25, %cst_15 [0] : vector<16x96xf32> to vector<96xf32>
    %27 = vector.shape_cast %26 : vector<96xf32> to vector<1x96xf32>
    %28 = vector.shape_cast %18 : vector<16x96xf32> to vector<1x16x96xf32>
    %c0_16 = arith.constant 0 : index
    %c0_17 = arith.constant 0 : index
    %c0_18 = arith.constant 0 : index
    %29 = vector.load %arg7[%c0_16, %c0_17, %c0_18] : memref<1x16x96xf32, #tpu.memory_space<vmem>>, vector<1x16x96xf32>
    tpu.vector_store %arg7[%c0_16, %c0_17, %c0_18], %28 {strides = array<i32>} : memref<1x16x96xf32, #tpu.memory_space<vmem>>, vector<1x16x96xf32>,
    %30 = tpu.concatenate %24, %27 in 0 : vector<1x96xf32>, vector<1x96xf32> -> vector<2x96xf32>
    %31 = vector.shape_cast %30 : vector<2x96xf32> to vector<1x2x96xf32>
    %c0_19 = arith.constant 0 : index
    %c0_20 = arith.constant 0 : index
    %c0_21 = arith.constant 0 : index
    %32 = vector.load %arg8[%c0_19, %c0_20, %c0_21] : memref<1x2x96xf32, #tpu.memory_space<vmem>>, vector<1x2x96xf32>
    tpu.vector_store %arg8[%c0_19, %c0_20, %c0_21], %31 {strides = array<i32>} : memref<1x2x96xf32, #tpu.memory_space<vmem>>, vector<1x2x96xf32>,
    return
  }
  func.func @transform_0(%arg0: i32) -> (i32, i32, i32) {
    %c0_i32 = arith.constant 0 : i32
    %c0_i32_0 = arith.constant 0 : i32
    %c0_i32_1 = arith.constant 0 : i32
    return %arg0, %c0_i32, %c0_i32_0 : i32, i32, i32
  }
  func.func @transform_1(%arg0: i32) -> (i32, i32) {
    %c0_i32 = arith.constant 0 : i32
    %c0_i32_0 = arith.constant 0 : i32
    %c0_i32_1 = arith.constant 0 : i32
    return %c0_i32, %c0_i32_0 : i32, i32
  }
  func.func @transform_2(%arg0: i32) -> (i32, i32) {
    %c0_i32 = arith.constant 0 : i32
    %c0_i32_0 = arith.constant 0 : i32
    %c0_i32_1 = arith.constant 0 : i32
    return %c0_i32, %c0_i32_0 : i32, i32
  }
  func.func @transform_3(%arg0: i32) -> (i32, i32) {
    %c0_i32 = arith.constant 0 : i32
    %c0_i32_0 = arith.constant 0 : i32
    %c0_i32_1 = arith.constant 0 : i32
    return %c0_i32, %c0_i32_0 : i32, i32
  }
  func.func @transform_4(%arg0: i32) -> (i32, i32) {
    %c0_i32 = arith.constant 0 : i32
    %c0_i32_0 = arith.constant 0 : i32
    %c0_i32_1 = arith.constant 0 : i32
    return %c0_i32, %c0_i32_0 : i32, i32
  }
  func.func @transform_5(%arg0: i32) -> (i32, i32, i32) {
    %c0_i32 = arith.constant 0 : i32
    %c0_i32_0 = arith.constant 0 : i32
    %c0_i32_1 = arith.constant 0 : i32
    return %arg0, %c0_i32, %c0_i32_0 : i32, i32, i32
  }
  func.func @transform_6(%arg0: i32) -> (i32, i32, i32) {
    %c0_i32 = arith.constant 0 : i32
    %c0_i32_0 = arith.constant 0 : i32
    %c0_i32_1 = arith.constant 0 : i32
    return %arg0, %c0_i32, %c0_i32_0 : i32, i32, i32
  }
  func.func @transform_7(%arg0: i32) -> (i32, i32, i32) {
    %c0_i32 = arith.constant 0 : i32
    %c0_i32_0 = arith.constant 0 : i32
    %c0_i32_1 = arith.constant 0 : i32
    return %arg0, %c0_i32, %c0_i32_0 : i32, i32, i32
  }
}

module attributes {stable_mosaic.version = 11 : i64} {
  func.func @_tail_kernel(%arg0: i32, %arg1: memref<2x16x96xf32, #tpu.memory_space<vmem>>, %arg2: memref<1x96xf32, #tpu.memory_space<vmem>>, %arg3: memref<1x96xf32, #tpu.memory_space<vmem>>, %arg4: memref<2x16x1xf32, #tpu.memory_space<vmem>>, %arg5: memref<96x64xbf16, #tpu.memory_space<vmem>>, %arg6: memref<1x64xf32, #tpu.memory_space<vmem>>, %arg7: memref<64x64xbf16, #tpu.memory_space<vmem>>, %arg8: memref<1x64xf32, #tpu.memory_space<vmem>>, %arg9: memref<64x10xbf16, #tpu.memory_space<vmem>>, %arg10: memref<1x10xf32, #tpu.memory_space<vmem>>, %arg11: memref<2x10xf32, #tpu.memory_space<vmem>>) attributes {dimension_semantics = [#tpu.dimension_semantics<parallel>], iteration_bounds = array<i64: 1>, scalar_prefetch = 0 : i64, scratch_operands = 0 : i64, tpu.core_type = #tpu.core_type<tc>, window_params = [{transform_indices = @transform_0, window_bounds = array<i64: 2, 16, 96>}, {pipeline_mode = #tpu.pipeline_mode<synchronous>, transform_indices = @transform_1, window_bounds = array<i64: 1, 96>}, {pipeline_mode = #tpu.pipeline_mode<synchronous>, transform_indices = @transform_2, window_bounds = array<i64: 1, 96>}, {transform_indices = @transform_3, window_bounds = array<i64: 2, 16, 1>}, {pipeline_mode = #tpu.pipeline_mode<synchronous>, transform_indices = @transform_4, window_bounds = array<i64: 96, 64>}, {pipeline_mode = #tpu.pipeline_mode<synchronous>, transform_indices = @transform_5, window_bounds = array<i64: 1, 64>}, {pipeline_mode = #tpu.pipeline_mode<synchronous>, transform_indices = @transform_6, window_bounds = array<i64: 64, 64>}, {pipeline_mode = #tpu.pipeline_mode<synchronous>, transform_indices = @transform_7, window_bounds = array<i64: 1, 64>}, {pipeline_mode = #tpu.pipeline_mode<synchronous>, transform_indices = @transform_8, window_bounds = array<i64: 64, 10>}, {pipeline_mode = #tpu.pipeline_mode<synchronous>, transform_indices = @transform_9, window_bounds = array<i64: 1, 10>}, {transform_indices = @transform_10, window_bounds = array<i64: 2, 10>}]} {
    %c0 = arith.constant 0 : index
    %c0_0 = arith.constant 0 : index
    %c0_1 = arith.constant 0 : index
    %0 = vector.load %arg1[%c0, %c0_0, %c0_1] : memref<2x16x96xf32, #tpu.memory_space<vmem>>, vector<2x16x96xf32>
    %c0_2 = arith.constant 0 : index
    %c0_3 = arith.constant 0 : index
    %1 = vector.load %arg2[%c0_2, %c0_3] : memref<1x96xf32, #tpu.memory_space<vmem>>, vector<1x96xf32>
    %2 = vector.shape_cast %1 : vector<1x96xf32> to vector<1x1x96xf32>
    %3 = vector.broadcast %2 : vector<1x1x96xf32> to vector<2x16x96xf32>
    %4 = arith.mulf %0, %3 : vector<2x16x96xf32>
    %c0_4 = arith.constant 0 : index
    %c0_5 = arith.constant 0 : index
    %5 = vector.load %arg3[%c0_4, %c0_5] : memref<1x96xf32, #tpu.memory_space<vmem>>, vector<1x96xf32>
    %6 = vector.shape_cast %5 : vector<1x96xf32> to vector<1x1x96xf32>
    %7 = vector.broadcast %6 : vector<1x1x96xf32> to vector<2x16x96xf32>
    %8 = arith.addf %4, %7 : vector<2x16x96xf32>
    %c0_6 = arith.constant 0 : index
    %c0_7 = arith.constant 0 : index
    %c0_8 = arith.constant 0 : index
    %9 = vector.load %arg4[%c0_6, %c0_7, %c0_8] : memref<2x16x1xf32, #tpu.memory_space<vmem>>, vector<2x16x1xf32>
    %10 = vector.broadcast %9 : vector<2x16x1xf32> to vector<2x16x96xf32>
    %11 = arith.mulf %8, %10 : vector<2x16x96xf32>
    %cst = arith.constant dense<0.000000e+00> : vector<2x96xf32>
    %12 = vector.multi_reduction <add>, %11, %cst [1] : vector<2x16x96xf32> to vector<2x96xf32>
    %13 = arith.truncf %12 : vector<2x96xf32> to vector<2x96xbf16>
    %c0_9 = arith.constant 0 : index
    %c0_10 = arith.constant 0 : index
    %14 = vector.load %arg5[%c0_9, %c0_10] : memref<96x64xbf16, #tpu.memory_space<vmem>>, vector<96x64xbf16>
    %cst_11 = arith.constant dense<0.000000e+00> : vector<2x64xf32>
    %15 = tpu.matmul %13, %14, %cst_11 {dimension_numbers = #tpu.dot_dimension_numbers<[1], [0], [0], [1], [0, 0, 1, 1], [], []>} : vector<2x96xbf16>, vector<96x64xbf16>, vector<2x64xf32> -> vector<2x64xf32>
    %c0_12 = arith.constant 0 : index
    %c0_13 = arith.constant 0 : index
    %16 = vector.load %arg6[%c0_12, %c0_13] : memref<1x64xf32, #tpu.memory_space<vmem>>, vector<1x64xf32>
    %17 = vector.broadcast %16 : vector<1x64xf32> to vector<2x64xf32>
    %18 = arith.addf %15, %17 : vector<2x64xf32>
    %cst_14 = arith.constant 0.000000e+00 : f32
    %19 = vector.broadcast %cst_14 : f32 to vector<2x64xf32>
    %20 = arith.maximumf %18, %19 : vector<2x64xf32>
    %21 = arith.truncf %20 : vector<2x64xf32> to vector<2x64xbf16>
    %c0_15 = arith.constant 0 : index
    %c0_16 = arith.constant 0 : index
    %22 = vector.load %arg7[%c0_15, %c0_16] : memref<64x64xbf16, #tpu.memory_space<vmem>>, vector<64x64xbf16>
    %cst_17 = arith.constant dense<0.000000e+00> : vector<2x64xf32>
    %23 = tpu.matmul %21, %22, %cst_17 {dimension_numbers = #tpu.dot_dimension_numbers<[1], [0], [0], [1], [0, 0, 1, 1], [], []>} : vector<2x64xbf16>, vector<64x64xbf16>, vector<2x64xf32> -> vector<2x64xf32>
    %c0_18 = arith.constant 0 : index
    %c0_19 = arith.constant 0 : index
    %24 = vector.load %arg8[%c0_18, %c0_19] : memref<1x64xf32, #tpu.memory_space<vmem>>, vector<1x64xf32>
    %25 = vector.broadcast %24 : vector<1x64xf32> to vector<2x64xf32>
    %26 = arith.addf %23, %25 : vector<2x64xf32>
    %cst_20 = arith.constant 0.000000e+00 : f32
    %27 = vector.broadcast %cst_20 : f32 to vector<2x64xf32>
    %28 = arith.maximumf %26, %27 : vector<2x64xf32>
    %29 = arith.truncf %28 : vector<2x64xf32> to vector<2x64xbf16>
    %c0_21 = arith.constant 0 : index
    %c0_22 = arith.constant 0 : index
    %30 = vector.load %arg9[%c0_21, %c0_22] : memref<64x10xbf16, #tpu.memory_space<vmem>>, vector<64x10xbf16>
    %cst_23 = arith.constant dense<0.000000e+00> : vector<2x10xf32>
    %31 = tpu.matmul %29, %30, %cst_23 {dimension_numbers = #tpu.dot_dimension_numbers<[1], [0], [0], [1], [0, 0, 1, 1], [], []>} : vector<2x64xbf16>, vector<64x10xbf16>, vector<2x10xf32> -> vector<2x10xf32>
    %c0_24 = arith.constant 0 : index
    %c0_25 = arith.constant 0 : index
    %32 = vector.load %arg10[%c0_24, %c0_25] : memref<1x10xf32, #tpu.memory_space<vmem>>, vector<1x10xf32>
    %33 = vector.broadcast %32 : vector<1x10xf32> to vector<2x10xf32>
    %34 = arith.addf %31, %33 : vector<2x10xf32>
    %cst_26 = arith.constant dense<0xFF800000> : vector<2xf32>
    %35 = vector.multi_reduction <maximumf>, %34, %cst_26 [1] : vector<2x10xf32> to vector<2xf32>
    %36 = vector.shape_cast %35 : vector<2xf32> to vector<2x1xf32>
    %37 = vector.broadcast %36 : vector<2x1xf32> to vector<2x10xf32>
    %38 = arith.subf %34, %37 : vector<2x10xf32>
    %39 = math.exp %38 : vector<2x10xf32>
    %cst_27 = arith.constant dense<0.000000e+00> : vector<2xf32>
    %40 = vector.multi_reduction <add>, %39, %cst_27 [1] : vector<2x10xf32> to vector<2xf32>
    %41 = vector.shape_cast %40 : vector<2xf32> to vector<2x1xf32>
    %42 = math.log %41 : vector<2x1xf32>
    %43 = vector.broadcast %36 : vector<2x1xf32> to vector<2x10xf32>
    %44 = arith.subf %34, %43 : vector<2x10xf32>
    %45 = vector.broadcast %42 : vector<2x1xf32> to vector<2x10xf32>
    %46 = arith.subf %44, %45 : vector<2x10xf32>
    %c0_28 = arith.constant 0 : index
    %c0_29 = arith.constant 0 : index
    %47 = vector.load %arg11[%c0_28, %c0_29] : memref<2x10xf32, #tpu.memory_space<vmem>>, vector<2x10xf32>
    tpu.vector_store %arg11[%c0_28, %c0_29], %46 {strides = array<i32>} : memref<2x10xf32, #tpu.memory_space<vmem>>, vector<2x10xf32>,
    return
  }
  func.func @transform_0(%arg0: i32) -> (i32, i32, i32) {
    %c0_i32 = arith.constant 0 : i32
    %c0_i32_0 = arith.constant 0 : i32
    %c0_i32_1 = arith.constant 0 : i32
    return %arg0, %c0_i32, %c0_i32_0 : i32, i32, i32
  }
  func.func @transform_1(%arg0: i32) -> (i32, i32) {
    %c0_i32 = arith.constant 0 : i32
    %c0_i32_0 = arith.constant 0 : i32
    %c0_i32_1 = arith.constant 0 : i32
    return %c0_i32, %c0_i32_0 : i32, i32
  }
  func.func @transform_2(%arg0: i32) -> (i32, i32) {
    %c0_i32 = arith.constant 0 : i32
    %c0_i32_0 = arith.constant 0 : i32
    %c0_i32_1 = arith.constant 0 : i32
    return %c0_i32, %c0_i32_0 : i32, i32
  }
  func.func @transform_3(%arg0: i32) -> (i32, i32, i32) {
    %c0_i32 = arith.constant 0 : i32
    %c0_i32_0 = arith.constant 0 : i32
    %c0_i32_1 = arith.constant 0 : i32
    return %arg0, %c0_i32, %c0_i32_0 : i32, i32, i32
  }
  func.func @transform_4(%arg0: i32) -> (i32, i32) {
    %c0_i32 = arith.constant 0 : i32
    %c0_i32_0 = arith.constant 0 : i32
    %c0_i32_1 = arith.constant 0 : i32
    return %c0_i32, %c0_i32_0 : i32, i32
  }
  func.func @transform_5(%arg0: i32) -> (i32, i32) {
    %c0_i32 = arith.constant 0 : i32
    %c0_i32_0 = arith.constant 0 : i32
    %c0_i32_1 = arith.constant 0 : i32
    return %c0_i32, %c0_i32_0 : i32, i32
  }
  func.func @transform_6(%arg0: i32) -> (i32, i32) {
    %c0_i32 = arith.constant 0 : i32
    %c0_i32_0 = arith.constant 0 : i32
    %c0_i32_1 = arith.constant 0 : i32
    return %c0_i32, %c0_i32_0 : i32, i32
  }
  func.func @transform_7(%arg0: i32) -> (i32, i32) {
    %c0_i32 = arith.constant 0 : i32
    %c0_i32_0 = arith.constant 0 : i32
    %c0_i32_1 = arith.constant 0 : i32
    return %c0_i32, %c0_i32_0 : i32, i32
  }
  func.func @transform_8(%arg0: i32) -> (i32, i32) {
    %c0_i32 = arith.constant 0 : i32
    %c0_i32_0 = arith.constant 0 : i32
    %c0_i32_1 = arith.constant 0 : i32
    return %c0_i32, %c0_i32_0 : i32, i32
  }
  func.func @transform_9(%arg0: i32) -> (i32, i32) {
    %c0_i32 = arith.constant 0 : i32
    %c0_i32_0 = arith.constant 0 : i32
    %c0_i32_1 = arith.constant 0 : i32
    return %c0_i32, %c0_i32_0 : i32, i32
  }
  func.func @transform_10(%arg0: i32) -> (i32, i32) {
    %c0_i32 = arith.constant 0 : i32
    %c0_i32_0 = arith.constant 0 : i32
    return %arg0, %c0_i32 : i32, i32
  }
}

</mosaic_0001>

<bundles_post_ra>
// kernel: mgt_forward.8
= control target key start
LH: loop header
LB: loop body
LE: loop exit
PB: predicated region body
PF: predicated region fallthrough
CT: control target
= control target key end

     0   :  { %s693_s24 = smov 0   ;;  %s759_s0 = inlined_call_operand.vmem [shape: f32[2,16,96], index: 0, kind: input, shape index: {}]   ;;  %s760_s1 = inlined_call_operand.vmem [shape: f32[1,96], index: 1, kind: input, shape index: {}]   ;;  %s761_s2 = inlined_call_operand.vmem [shape: f32[1,96], index: 2, kind: input, shape index: {}]   ;;  %s762_s3 = inlined_call_operand.vmem [shape: bf16[96,96], index: 3, kind: input, shape index: {}]   ;;  %s763_s4 = inlined_call_operand.vmem [shape: f32[1,96], index: 4, kind: input, shape index: {}]   ;;  %s764_s5 = inlined_call_operand.vmem [shape: f32[2,16,1], index: 5, kind: input, shape index: {}]   ;;  %s765_s6 = inlined_call_operand.vmem [shape: f32[2,16,96], index: 6, kind: output, shape index: {0}]   ;;  %s766_s7 = inlined_call_operand.vmem [shape: f32[2,2,96], index: 7, kind: output, shape index: {1}]  }
   0x1 LB: > { %s574_s25 = sadd.s32 4294967295, %s648_s24   ;;  %p578_p0 = scmp.ge.s32.totalorder %s648_s24, 1  ;;  %s648_s24 = sphi %s693_s24, %s18_s24  }
   0x2   : > { %p250_p1 = scmp.lt.s32.totalorder %s648_s24, 3 }
   0x4   : > { %p251_p2 = pnand %p578_p0, %p250_p1 }
   0x5   : > { %v636_v0 = vld [vmem:[%s762_s3] sm:$0xff] (!%p251_p2)   ;;  %v650_v1 = vmov (!%p251_p2), 0.0   ;;  %v637_v2 = vld [vmem:[%s762_s3 + $0x8] sm:$0xff] (!%p251_p2)   ;;  %vm651_vm0 = vmmov (!%p251_p2), 0   ;;  %p291_p3 = scmp.lt.s32.totalorder (!%p251_p2), %s574_s25, 1  ;;  %v638_v3 = vld [vmem:[%s762_s3 + $0x10] sm:$0xff] (!%p251_p2)  }
   0x6   : > { %254 = sbr.rel (%p251_p2) target bundleno = 271 (0x10f), region = 44  ;;  %608 = vmatprep.subr.bf16.mxu0 (!%p251_p2), %v650_v1  ;;  %620 = vmatprep.mubr.msk.bf16.mxu0 (!%p251_p2), %vm651_vm0, %v650_v1  ;;  %v652_v4 = vmov (!%p251_p2), 0   ;;  %v639_v6 = vld [vmem:[%s762_s3 + $0x18] sm:$0xff] (!%p251_p2)   ;;  %v586_v7 = vld [vmem:[%s760_s1] ss:$0 sm:$0xff] (!%p251_p2)  ;;  %v641_v17 = vld [vmem:[%s762_s3 + $0x28] sm:$0xff] (!%p251_p2)  }
   0x7   : > { %609 = vmatpush3.bf16.msra.mxu0 (!%p251_p2), %v636_v0  ;;  %635 = vset.pattern.permute.xlu0 (!%p251_p2), %v652_v4  ;;  %v640_v13 = vld [vmem:[%s762_s3 + $0x20] sm:$0xff] (!%p251_p2)   ;;  %vm387_vm1 = vcmask (!%p251_p2), 785408   ;;  %vm472_vm2 = vcmask (!%p251_p2), 1040384   ;;  %vm474_vm3 = vcmask (!%p251_p2), 779264  }
   0x8   : > { %610 = vmatprep.subr.bf16.mxu0 (!%p251_p2), %v650_v1  ;;  %v587_v14 = vld [vmem:[%s761_s2] ss:$0 sm:$0xff] (!%p251_p2) }
   0x9   : > { %v588_v19 = vld [vmem:[%s763_s4] ss:$0 sm:$0xff] (!%p251_p2) }
   0xb   : > { %611 = vmatpush3.bf16.msra.mxu0 (!%p251_p2), %v637_v2 }
   0xc   : > { %612 = vmatprep.subr.bf16.mxu0 (!%p251_p2), %v650_v1 }
   0xd   : > { %s768_s25 = smov (!%p291_p3, %s574_s25), 1 }
   0xe   : > { %s713_s9 = sshll.u32 %s768_s25, 4 }
   0xf   : > { %s295_s12 = scalar_lea.vmem %s759_s0, %s713_s9  ;;  %s300_s15 = scalar_lea.vmem %s764_s5, %s713_s9  ;;  %613 = vmatpush3.bf16.msra.mxu0 %v638_v3 }
  0x10   : > { %v436_v5 = vld [vmem:[%s300_s15] sm:$0xff]  ;;  %v312_v9 = vld [vmem:[%s295_s12 + $0x8] sm:$0xff]  ;;  %614 = vmatprep.subr.bf16.mxu0 %v650_v1  ;;  %s305_s10 = scalar_lea.vmem %s765_s6, %s713_s9  ;;  %s585_s9 = sshll.u32 %s768_s25, 1 }
  0x11   : > { %440 = vperm.xlu0 %635, %v436_v5   ;;  %v311_v8 = vld [vmem:[%s295_s12] sm:$0xff]  ;;  %v437_v10 = vld [vmem:[%s300_s15 + $0x8] sm:$0xff]  ;;  %v321_v12 = vmul.f32 %v586_v7, %v312_v9  ;;  %s309_s13 = scalar_lea.vmem %s766_s7, %s585_s9 }
  0x12   : > { %v320_v11 = vmul.f32 %v586_v7, %v311_v8 }
  0x13   : > { %615 = vmatpush3.bf16.msra.mxu0 %v639_v6  ;;  %v330_v16 = vadd.f32 %v587_v14, %v321_v12 }
  0x14   : > { %616 = vmatprep.subr.bf16.mxu0 %v650_v1  ;;  %v329_v15 = vadd.f32 %v587_v14, %v320_v11 }
  0x15   : > { %445 = vperm.xlu0 %635, %v437_v10  }
  0x16   : > { %v331_v18 = vpack.c.bf16 %v330_v16, %v329_v15 }
  0x17   : > { %617 = vmatpush3.bf16.msra.mxu0 %v640_v13 }
  0x18   : > { %618 = vmatprep.subr.bf16.mxu0 %v650_v1 }
  0x1b   : > { %619 = vmatpush3.bf16.msra.mxu0 %v641_v17 }
  0x1e   : > { %621 = vmatmul.mubr.msk.bf16.vlgmr.msra.gmra.mrb[0].mxu0 %vm387_vm1, %v331_v18 }
  0x90   : > { %v441_v23 = vpop.permute.xlu0 %440 }
  0x94   : > { %v446_v32 = vpop.permute.xlu0 %445 }
  0xf1   : > { %v425_v20 = vpop.f32.mrb[0].mxu0 }
  0xf2   : > { %v426_v21 = vadd.f32 %v588_v19, %v425_v20  ;;  %v622_v22 = vpop.f32.mrb[1].mxu0 }
  0xf3   : > { %v428_v24 = vpop.f32.mrb[2].mxu0 }
  0xf4   : > { %v432_v25 = vmax.f32 %v426_v21, 0.0  ;;  %v429_v26 = vadd.f32 %v588_v19, %v428_v24  ;;  %v623_v27 = vpop.f32.mrb[3].mxu0 }
  0xf6   : > { %v434_v28 = vadd.f32 %v432_v25, %v329_v15  ;;  %v433_v29 = vmax.f32 %v429_v26, 0.0 }
  0xf8   : > { %470 = vst.msk [vmem:[%s305_s10] sm:$0xff] %vm387_vm1, %v434_v28  ;;  %v435_v30 = vadd.f32 %v433_v29, %v330_v16  ;;  %v448_v31 = vmul.f32 %v441_v23, %v434_v28 }
  0xfa   : > { %471 = vst.msk [vmem:[%s305_s10 + $0x8] sm:$0xff] %vm387_vm1, %v435_v30  ;;  %v449_v33 = vmul.f32 %v446_v32, %v435_v30  ;;  %v459_v34 = vmul.f32 %v448_v31, %v434_v28  ;;  %v450_v35 = vsel %vm387_vm1, %v448_v31, 0.0 }
  0xfc   : > { %v451_v36 = vsel %vm387_vm1, %v449_v33, 0.0  ;;  %v460_v37 = vmul.f32 %v449_v33, %v435_v30  ;;  %v461_v39 = vsel %vm387_vm1, %v459_v34, 0.0 }
  0xfd   : > { %v452_v38 = vadd.f32 %v451_v36, %v450_v35 }
  0xfe   : > { %v462_v40 = vsel %vm387_vm1, %v460_v37, 0.0 }
  0xff   : > { %v453_v41 = vrot.slane %v452_v38, 4  ;;  %v463_v42 = vadd.f32 %v462_v40, %v461_v39 }
 0x101   : > { %v454_v43 = vadd.f32 %v453_v41, %v452_v38  ;;  %v464_v44 = vrot.slane %v463_v42, 4 }
 0x103   : > { %v455_v45 = vrot.slane %v454_v43, 2  ;;  %v465_v46 = vadd.f32 %v464_v44, %v463_v42 }
 0x105   : > { %v456_v47 = vadd.f32 %v455_v45, %v454_v43  ;;  %v466_v48 = vrot.slane %v465_v46, 2 }
 0x107   : > { %v457_v49 = vrot.slane %v456_v47, 1  ;;  %v467_v50 = vadd.f32 %v466_v48, %v465_v46 }
 0x109   : > { %v468_v51 = vrot.slane %v467_v50, 1  ;;  %v458_v52 = vadd.f32 %v457_v49, %v456_v47 }
 0x10b   : > { %v469_v53 = vadd.f32 %v468_v51, %v467_v50 }
 0x10d   : > { %v473_v54 = vsel %vm472_vm2, %v458_v52, %v469_v53 }
 0x10e   : > { %475 = vst.msk [vmem:[%s309_s13] sm:$0x3] %vm474_vm3, %v473_v54 }
 0x10f PF: > { %s18_s24 = sadd.s32 1, %s648_s24  }
 0x110   : > { %p15_p4 = scmp.ge.s32.totalorder %s18_s24, 4  }
 0x112   :  { %17 = sbr.rel (!%p15_p4) target bundleno = 1 (0x1), region = 89 }

// kernel: mgt_forward.6
= control target key start
LH: loop header
LB: loop body
LE: loop exit
PB: predicated region body
PF: predicated region fallthrough
CT: control target
= control target key end

     0   :  { %s510_s15 = smov 0   ;;  %s536_s0 = inlined_call_operand.vmem [shape: f32[2,16,2], index: 0, kind: input, shape index: {}]   ;;  %s537_s1 = inlined_call_operand.vmem [shape: f32[2,32], index: 1, kind: input, shape index: {}]   ;;  %s538_s2 = inlined_call_operand.vmem [shape: f32[2,16,32], index: 2, kind: input, shape index: {}]   ;;  %s539_s3 = inlined_call_operand.vmem [shape: f32[2,16,32], index: 3, kind: input, shape index: {}]   ;;  %s540_s4 = inlined_call_operand.vmem [shape: f32[2,16,96], index: 4, kind: output, shape index: {}]  }
   0x1 LB: > { %s435_s16 = sadd.s32 4294967295, %s481_s15   ;;  %p439_p0 = scmp.ge.s32.totalorder %s481_s15, 1  ;;  %s481_s15 = sphi %s510_s15, %s14_s15  }
   0x2   : > { %p182_p1 = scmp.lt.s32.totalorder %s481_s15, 3 }
   0x4   : > { %p183_p2 = pnand %p439_p0, %p182_p1 }
   0x5   : > { %v240_v0 = vld [vmem:[%s537_s1] sm:$0x3] (!%p183_p2)  ;;  %vm248_vm0 = vcmask (!%p183_p2), 1041408   ;;  %p218_p3 = scmp.lt.s32.totalorder (!%p183_p2), %s435_s16, 1  ;;  %vm241_vm1 = vcmask (!%p183_p2), 15360   ;;  %s483_s29 = smov (!%p183_p2), 32  }
   0x6   : > { %186 = sbr.rel (%p183_p2) target bundleno = 234 (0xea), region = 36  ;;  %460 = vmatprep.subr.msk.mxu0 (!%p183_p2), %vm248_vm0, %v240_v0  ;;  %s484_s30 = smov (!%p183_p2), 64   ;;  %vm347_vm2 = vcmask (!%p183_p2), 261120   ;;  %vm350_vm3 = vcmask (!%p183_p2), 523264   ;;  %vm353_vm4 = vcmask (!%p183_p2), 785408  }
   0x7   : > { %461 = vmatpush3.msk.msra.mxu0 (!%p183_p2), %vm248_vm0, %v240_v0 }
   0xd   : > { %s542_s16 = smov (!%p218_p3, %s435_s16), 1 }
   0xe   : > { %s453_s19 = sshll.u32 %s542_s16, 4 }
   0xf   : > { %s222_s22 = scalar_lea.vmem %s536_s0, %s453_s19  ;;  %s227_s25 = scalar_lea.vmem %s538_s2, %s453_s19 }
  0x10   : > { %v238_v1 = vld [vmem:[%s222_s22] sm:$0xff]  ;;  %v239_v2 = vld [vmem:[%s222_s22 + $0x8] sm:$0xff]  ;;  %s232_s28 = scalar_lea.vmem %s539_s3, %s453_s19  ;;  %s237_s7 = scalar_lea.vmem %s540_s4, %s453_s19 }
  0x11   : > { %v327_v3 = vld [vmem:[%s227_s25] sm:$0xff]  ;;  %462 = vmatprep.mubr.msk.f32.mxu0 %vm241_vm1, %v238_v1  ;;  %v328_v5 = vld [vmem:[%s227_s25 + $0x8] sm:$0xff] }
  0x12   : > { %333 = vrot.lane.b32.xlu0 %v327_v3, %s483_s29  ;;  %v329_v4 = vld [vmem:[%s232_s28] sm:$0xff]  ;;  %463 = vmatmul.mubr.msk.f32.vlgmr.msra.gmra.mrb[0].mxu0 %vm241_vm1, %v239_v2  ;;  %v330_v6 = vld [vmem:[%s232_s28 + $0x8] sm:$0xff] }
  0x13   : > { %341 = vrot.lane.b32.xlu1 %v329_v4, %s484_s30 }
  0x16   : > { %335 = vrot.lane.b32.xlu0 %v328_v5, %s483_s29 }
  0x17   : > { %343 = vrot.lane.b32.xlu1 %v330_v6, %s484_s30 }
  0x84   : > { %v334_v7 = vpop.permute.xlu0 %333 }
  0x85   : > { %v342_v8 = vpop.permute.xlu1 %341 }
  0x88   : > { %v336_v9 = vpop.permute.xlu0 %335 }
  0x89   : > { %v344_v10 = vpop.permute.xlu1 %343 }
  0xe5   : > { %v464_v11 = vpop.f32.mrb[0].mxu0 }
  0xe6   : > { %v349_v12 = vsel %vm347_vm2, %v464_v11, %v336_v9  ;;  %v318_v13 = vpop.f32.mrb[1].mxu0 }
  0xe7   : > { %v352_v14 = vsel %vm350_vm3, %v349_v12, %v344_v10  ;;  %v348_v15 = vsel %vm347_vm2, %v318_v13, %v334_v7 }
  0xe8   : > { %355 = vst.msk [vmem:[%s237_s7 + $0x8] sm:$0xff] %vm353_vm4, %v352_v14  ;;  %v351_v16 = vsel %vm350_vm3, %v348_v15, %v342_v8 }
  0xe9   : > { %354 = vst.msk [vmem:[%s237_s7] sm:$0xff] %vm353_vm4, %v351_v16 }
  0xea PF: > { %s14_s15 = sadd.s32 1, %s481_s15  }
  0xeb   : > { %p11_p4 = scmp.ge.s32.totalorder %s14_s15, 4  }
  0xed   :  { %13 = sbr.rel (!%p11_p4) target bundleno = 1 (0x1), region = 72 }

// kernel: mgt_forward.7
= control target key start
LH: loop header
LB: loop body
LE: loop exit
PB: predicated region body
PF: predicated region fallthrough
CT: control target
= control target key end

     0   :  { %s2949_s13 = smov 0   ;;  %s2951_s14 = smov 0   ;;  %s3321_s0 = inlined_call_operand.vmem [shape: f32[1,96], index: 0, kind: input, shape index: {}]   ;;  %s3322_s1 = inlined_call_operand.vmem [shape: f32[1,96], index: 1, kind: input, shape index: {}]   ;;  %s3323_s2 = inlined_call_operand.vmem [shape: f32[2,16,96], index: 2, kind: input, shape index: {}]   ;;  %s3324_s3 = inlined_call_operand.vmem [shape: bf16[3,96,1536], index: 3, kind: input, shape index: {}]   ;;  %s3325_s4 = inlined_call_operand.vmem [shape: bf16[3,512,96], index: 4, kind: input, shape index: {}]   ;;  %s3326_s5 = inlined_call_operand.vmem [shape: bf16[3,2,16,16], index: 5, kind: input, shape index: {}]   ;;  %s3327_s6 = inlined_call_operand.vmem [shape: bf16[3,96,96], index: 6, kind: input, shape index: {}]   ;;  %s3328_s7 = inlined_call_operand.vmem [shape: f32[1,96], index: 7, kind: input, shape index: {}]   ;;  %s3329_s8 = inlined_call_operand.vmem [shape: f32[2,16,1], index: 8, kind: input, shape index: {}]   ;;  %s3330_s9 = inlined_call_operand.vmem [shape: f32[2,16,96], index: 9, kind: output, shape index: {0}]   ;;  %s3331_s10 = inlined_call_operand.vmem [shape: f32[2,2,96], index: 10, kind: output, shape index: {1}]  }
   0x1   :  { %s2953_s15 = smov 0   ;;  %s2955_s16 = smov 0  }
   0x2   :  { %s2957_s17 = smov 0  }
   0x3 LB: > { %s30_s18 = sadd.s32 1, %s2880_s15  ;;  %s33_s19 = sadd.s32 1, %s2884_s16  ;;  %s2888_s17 = sphi %s2957_s17, %s21_s17   ;;  %s2884_s16 = sphi %s2955_s16, %s3335_s16   ;;  %s2880_s15 = sphi %s2953_s15, %s3334_s15   ;;  %s2876_s14 = sphi %s2951_s14, %s3333_s14   ;;  %s2872_s13 = sphi %s2949_s13, %s3332_s13  }
   0x4   : > { %p31_p0 = scmp.ge.s32.totalorder %s30_s18, 3  ;;  %p2342_p1 = scmp.ge.s32.totalorder %s2888_s17, 1 }
   0x5   : > { %p383_p2 = scmp.lt.s32.totalorder %s2888_s17, 7 }
   0x6   : > { %s3337_s18 = smov (%p31_p0, %s30_s18), 0  ;;  %s3339_s19 = smov (!%p31_p0, %s33_s19), %s2884_s16 }
   0x7   : > { %p384_p3 = pnand %p2342_p1, %p383_p2  ;;  %p35_p4 = scmp.ge.s32.totalorder %s3339_s19, 2 }
   0x8   : > { %p459_p5 = scmp.lt.s32.totalorder (!%p384_p3), %s2872_s13, 2  ;;  %p454_p6 = scmp.lt.s32.totalorder (!%p384_p3), %s2876_s14, 1  ;;  %v2890_v0 = vmov (!%p384_p3), 0   ;;  %v2357_v12 = vld [vmem:[%s3321_s0] ss:$0 sm:$0xff] (!%p384_p3)  ;;  %vm951_vm0 = vcmask (!%p384_p3), 785408  }
   0x9   : > { %s3341_s19 = smov (%p35_p4, %s3339_s19), 0  ;;  %387 = sbr.rel (%p384_p3) target bundleno = 1672 (0x688), region = 56 }
   0xa   : > { %987 = vmatprep.mubr.bf16.mxu0 (!%p384_p3), %v2890_v0  ;;  %1030 = vmatprep.mubr.bf16.mxu1 (!%p384_p3), %v2890_v0  ;;  %v2358_v20 = vld [vmem:[%s3322_s1] ss:$0 sm:$0xff] (!%p384_p3)  ;;  %vm2892_vm1 = vmmov (!%p384_p3), 0   ;;  %vm1261_vm2 = vcmask (!%p384_p3), 130048   ;;  %p2480_p7 = scmp.ne.s32.totalorder (!%p384_p3), %s2872_s13, 0 }
  0x10   : > { %s2985_s20 = scalar_select %p459_p5, %s2872_s13, 2 }
  0x11   : > { %s3343_s14 = smov (!%p454_p6, %s2876_s14), 1 }
  0x12   : > { %s2625_s21 = smul.u32 576, %s2985_s20  ;;  %s2486_s25 = sshll.u32 %s3343_s14, 4 }
  0x13   : > { %s3000_s28 = scalar_lea.vmem %s3329_s8, %s2486_s25  ;;  %s3005_s11 = scalar_lea.vmem %s3330_s9, %s2486_s25 }
  0x14   : > { %s2993_s24 = scalar_lea.vmem %s3324_s3, %s2625_s21  ;;  %s458_s26 = scalar_lea.vmem %s3323_s2, %s2486_s25 }
  0x15   : > { %v2671_v1 = vld [vmem:[%s2993_s24 + $0x4] ss:$48 sps:$4 sm:$0xff]   ;;  %v2673_v2 = vld [vmem:[%s2993_s24] ss:$48 sps:$4 sm:$0xff]   ;;  %v2680_v6 = vld [vmem:[%s2993_s24 + $0xc] ss:$48 sps:$4 sm:$0xff]  }
  0x16   : > { %955 = vmatprep.subr.bf16.mxu0 %v2671_v1  ;;  %v2674_v3 = vld [vmem:[%s2993_s24 + $0x64] ss:$48 sps:$4 sm:$0xff]   ;;  %v2676_v4 = vld [vmem:[%s2993_s24 + $0x60] ss:$48 sps:$4 sm:$0xff]   ;;  %v2682_v7 = vld [vmem:[%s2993_s24 + $0x8] ss:$48 sps:$4 sm:$0xff]   ;;  %998 = vmatprep.subr.bf16.mxu1 %v2680_v6 }
  0x17   : > { %956 = vmatpush1.bf16.msra.mxu0 %v2673_v2  ;;  %v2677_v5 = vld [vmem:[%s2993_s24 + $0xc4] ss:$48 sps:$4 sm:$0xff]   ;;  %v2679_v8 = vld [vmem:[%s2993_s24 + $0xc0] ss:$48 sps:$4 sm:$0xff]   ;;  %999 = vmatpush1.bf16.msra.mxu1 %v2682_v7  ;;  %v2686_v9 = vld [vmem:[%s2993_s24 + $0x6c] ss:$48 sps:$4 sm:$0xff]  }
  0x18   : > { %957 = vmatprep.subr.bf16.mxu0 %v2674_v3  ;;  %v2688_v10 = vld [vmem:[%s2993_s24 + $0x68] ss:$48 sps:$4 sm:$0xff]   ;;  %v2683_v11 = vld [vmem:[%s2993_s24 + $0x124] ss:$48 sps:$4 sm:$0xff]   ;;  %1000 = vmatprep.subr.bf16.mxu1 %v2686_v9  ;;  %v2685_v13 = vld [vmem:[%s2993_s24 + $0x120] ss:$48 sps:$4 sm:$0xff]  }
  0x19   : > { %v2692_v14 = vld [vmem:[%s2993_s24 + $0xcc] ss:$48 sps:$4 sm:$0xff]   ;;  %v2689_v15 = vld [vmem:[%s2993_s24 + $0x184] ss:$48 sps:$4 sm:$0xff]   ;;  %v2694_v16 = vld [vmem:[%s2993_s24 + $0xc8] ss:$48 sps:$4 sm:$0xff]  }
  0x1a   : > { %v2698_v17 = vld [vmem:[%s2993_s24 + $0x12c] ss:$48 sps:$4 sm:$0xff]   ;;  %v498_v18 = vld [vmem:[%s458_s26] sm:$0xff]  ;;  %v2700_v24 = vld [vmem:[%s2993_s24 + $0x128] ss:$48 sps:$4 sm:$0xff]   ;;  %s2349_s21 = sshll.u32 %s2985_s20, 2 }
  0x1b   : > { %958 = vmatpush1.bf16.msra.mxu0 %v2676_v4  ;;  %1001 = vmatpush1.bf16.msra.mxu1 %v2688_v10  ;;  %v499_v19 = vld [vmem:[%s458_s26 + $0x8] sm:$0xff]  ;;  %v2691_v21 = vld [vmem:[%s2993_s24 + $0x180] ss:$48 sps:$4 sm:$0xff]   ;;  %v507_v22 = vmul.f32 %v2357_v12, %v498_v18  ;;  %v2695_v25 = vld [vmem:[%s2993_s24 + $0x1e4] ss:$48 sps:$4 sm:$0xff]   ;;  %v2891_v18 = vmov 0.0  }
  0x1c   : > { %959 = vmatprep.subr.bf16.mxu0 %v2677_v5  ;;  %1002 = vmatprep.subr.bf16.mxu1 %v2692_v14  ;;  %v508_v23 = vmul.f32 %v2357_v12, %v499_v19  ;;  %v2704_v26 = vld [vmem:[%s2993_s24 + $0x18c] ss:$48 sps:$4 sm:$0xff]   ;;  %v2697_v27 = vld [vmem:[%s2993_s24 + $0x1e0] ss:$48 sps:$4 sm:$0xff]   ;;  %v2706_v30 = vld [vmem:[%s2993_s24 + $0x188] ss:$48 sps:$4 sm:$0xff]  }
  0x1d   : > { %v3036_v28 = vadd.f32 %v2358_v20, %v507_v22  ;;  %v2703_v31 = vld [vmem:[%s2993_s24 + $0x14] ss:$48 sps:$4 sm:$0xff]   ;;  %v2710_v32 = vld [vmem:[%s2993_s24 + $0x1ec] ss:$48 sps:$4 sm:$0xff]   ;;  %v2701_v34 = vld [vmem:[%s2993_s24 + $0x10] ss:$48 sps:$4 sm:$0xff]  }
  0x1e   : > { %v3038_v29 = vadd.f32 %v2358_v20, %v508_v23  ;;  %v2712_v35 = vld [vmem:[%s2993_s24 + $0x1e8] ss:$48 sps:$4 sm:$0xff]   ;;  %v2709_v36 = vld [vmem:[%s2993_s24 + $0x74] ss:$48 sps:$4 sm:$0xff]   ;;  %v2718_v37 = vld [vmem:[%s2993_s24 + $0x1c] ss:$48 sps:$4 sm:$0xff]  }
  0x1f   : > { %960 = vmatpush1.bf16.msra.mxu0 %v2679_v8  ;;  %1003 = vmatpush1.bf16.msra.mxu1 %v2694_v16  ;;  %v2707_v38 = vld [vmem:[%s2993_s24 + $0x70] ss:$48 sps:$4 sm:$0xff]   ;;  %v2716_v39 = vld [vmem:[%s2993_s24 + $0x18] ss:$48 sps:$4 sm:$0xff]   ;;  %v2715_v40 = vld [vmem:[%s2993_s24 + $0xd4] ss:$48 sps:$4 sm:$0xff]  }
  0x20   : > { %961 = vmatprep.subr.bf16.mxu0 %v2683_v11  ;;  %1004 = vmatprep.subr.bf16.mxu1 %v2698_v17  ;;  %v3045_v33 = vpack.c.bf16 %v3038_v29, %v3036_v28  ;;  %v2724_v41 = vld [vmem:[%s2993_s24 + $0x7c] ss:$48 sps:$4 sm:$0xff]   ;;  %v2713_v42 = vld [vmem:[%s2993_s24 + $0xd0] ss:$48 sps:$4 sm:$0xff]   ;;  %v2722_v43 = vld [vmem:[%s2993_s24 + $0x78] ss:$48 sps:$4 sm:$0xff]  }
  0x21   : > { %v2721_v44 = vld [vmem:[%s2993_s24 + $0x134] ss:$48 sps:$4 sm:$0xff]   ;;  %v2730_v45 = vld [vmem:[%s2993_s24 + $0xdc] ss:$48 sps:$4 sm:$0xff]   ;;  %v2719_v46 = vld [vmem:[%s2993_s24 + $0x130] ss:$48 sps:$4 sm:$0xff]  }
  0x22   : > { %v2728_v47 = vld [vmem:[%s2993_s24 + $0xd8] ss:$48 sps:$4 sm:$0xff]   ;;  %v2727_v48 = vld [vmem:[%s2993_s24 + $0x194] ss:$48 sps:$4 sm:$0xff]   ;;  %v2736_v49 = vld [vmem:[%s2993_s24 + $0x13c] ss:$48 sps:$4 sm:$0xff]  }
  0x23   : > { %962 = vmatpush1.bf16.msra.mxu0 %v2685_v13  ;;  %1005 = vmatpush1.bf16.msra.mxu1 %v2700_v24  ;;  %v2725_v50 = vld [vmem:[%s2993_s24 + $0x190] ss:$48 sps:$4 sm:$0xff]   ;;  %v2734_v51 = vld [vmem:[%s2993_s24 + $0x138] ss:$48 sps:$4 sm:$0xff]   ;;  %v2733_v52 = vld [vmem:[%s2993_s24 + $0x1f4] ss:$48 sps:$4 sm:$0xff]  }
  0x24   : > { %963 = vmatprep.subr.bf16.mxu0 %v2689_v15  ;;  %1006 = vmatprep.subr.bf16.mxu1 %v2704_v26  ;;  %v2739_v53 = vld [vmem:[%s2993_s24 + $0x19c] ss:$48 sps:$4 sm:$0xff]   ;;  %v2731_v54 = vld [vmem:[%s2993_s24 + $0x1f0] ss:$48 sps:$4 sm:$0xff]   ;;  %v2737_v55 = vld [vmem:[%s2993_s24 + $0x198] ss:$48 sps:$4 sm:$0xff]  }
  0x25   : > { %v2742_v56 = vld [vmem:[%s2993_s24 + $0x1fc] ss:$48 sps:$4 sm:$0xff]   ;;  %v2740_v57 = vld [vmem:[%s2993_s24 + $0x1f8] ss:$48 sps:$4 sm:$0xff]   ;;  %v2748_v60 = vld [vmem:[%s2993_s24 + $0x24] ss:$48 sps:$4 sm:$0xff]  }
  0x26   : > { %v2745_v58 = vld [vmem:[%s2993_s24 + $0x2c] ss:$48 sps:$4 sm:$0xff]   ;;  %v2743_v59 = vld [vmem:[%s2993_s24 + $0x28] ss:$48 sps:$4 sm:$0xff]   ;;  %v2746_v61 = vld [vmem:[%s2993_s24 + $0x20] ss:$48 sps:$4 sm:$0xff]  }
  0x27   : > { %964 = vmatpush1.bf16.msra.mxu0 %v2691_v21  ;;  %1007 = vmatpush1.bf16.msra.mxu1 %v2706_v30  ;;  %v2751_v62 = vld [vmem:[%s2993_s24 + $0x8c] ss:$48 sps:$4 sm:$0xff]   ;;  %v2749_v63 = vld [vmem:[%s2993_s24 + $0x88] ss:$48 sps:$4 sm:$0xff]   ;;  %v2754_v1 = vld [vmem:[%s2993_s24 + $0x84] ss:$48 sps:$4 sm:$0xff]  }
  0x28   : > { %965 = vmatprep.subr.bf16.mxu0 %v2695_v25  ;;  %1008 = vmatprep.subr.bf16.mxu1 %v2710_v32  ;;  %v2752_v2 = vld [vmem:[%s2993_s24 + $0x80] ss:$48 sps:$4 sm:$0xff]   ;;  %v2755_v3 = vld [vmem:[%s2993_s24 + $0xe8] ss:$48 sps:$4 sm:$0xff]   ;;  %v2760_v5 = vld [vmem:[%s2993_s24 + $0xe4] ss:$48 sps:$4 sm:$0xff]  }
  0x29   : > { %v2758_v4 = vld [vmem:[%s2993_s24 + $0xe0] ss:$48 sps:$4 sm:$0xff]   ;;  %v2763_v6 = vld [vmem:[%s2993_s24 + $0x14c] ss:$48 sps:$4 sm:$0xff]   ;;  %v2766_v7 = vld [vmem:[%s2993_s24 + $0x144] ss:$48 sps:$4 sm:$0xff]  }
  0x2a   : > { %v2761_v8 = vld [vmem:[%s2993_s24 + $0x148] ss:$48 sps:$4 sm:$0xff]   ;;  %v2764_v9 = vld [vmem:[%s2993_s24 + $0x140] ss:$48 sps:$4 sm:$0xff]   ;;  %v2769_v10 = vld [vmem:[%s2993_s24 + $0x1ac] ss:$48 sps:$4 sm:$0xff]  }
  0x2b   : > { %966 = vmatpush1.bf16.msra.mxu0 %v2697_v27  ;;  %1009 = vmatpush1.bf16.msra.mxu1 %v2712_v35  ;;  %v2772_v11 = vld [vmem:[%s2993_s24 + $0x1a4] ss:$48 sps:$4 sm:$0xff]   ;;  %v2767_v12 = vld [vmem:[%s2993_s24 + $0x1a8] ss:$48 sps:$4 sm:$0xff]   ;;  %v2770_v13 = vld [vmem:[%s2993_s24 + $0x1a0] ss:$48 sps:$4 sm:$0xff]  }
  0x2c   : > { %1041 = vmatprep.subr.bf16.mxu0 %v2703_v31  ;;  %1084 = vmatprep.subr.bf16.mxu1 %v2718_v37  ;;  %v2775_v14 = vld [vmem:[%s2993_s24 + $0x20c] ss:$48 sps:$4 sm:$0xff]   ;;  %v2778_v15 = vld [vmem:[%s2993_s24 + $0x204] ss:$48 sps:$4 sm:$0xff]   ;;  %v2773_v16 = vld [vmem:[%s2993_s24 + $0x208] ss:$48 sps:$4 sm:$0xff]  }
  0x2d   : > { %v2776_v17 = vld [vmem:[%s2993_s24 + $0x200] ss:$48 sps:$4 sm:$0xff]  }
  0x2e   : > { %2431 = vmatmul.mubr.msk.bf16.vlgmr.msra.gmra.mrb[0].mxu0 %vm951_vm0, %v3045_v33  ;;  %2432 = vmatmul.mubr.msk.bf16.vlgmr.msra.gmra.mrb[0].mxu1 %vm951_vm0, %v3045_v33 }
  0x2f   : > { %1042 = vmatpush1.bf16.msra.mxu0 %v2701_v34  ;;  %1073 = vmatprep.mubr.bf16.mxu0 %v2890_v0 }
  0x30   : > { %1043 = vmatprep.subr.bf16.mxu0 %v2709_v36  ;;  %1085 = vmatpush1.bf16.msra.mxu1 %v2716_v39 }
  0x31   : > { %1086 = vmatprep.subr.bf16.mxu1 %v2724_v41  ;;  %1116 = vmatprep.mubr.bf16.mxu1 %v2890_v0 }
  0x33   : > { %1044 = vmatpush1.bf16.msra.mxu0 %v2707_v38 }
  0x34   : > { %1045 = vmatprep.subr.bf16.mxu0 %v2715_v40  ;;  %1087 = vmatpush1.bf16.msra.mxu1 %v2722_v43 }
  0x35   : > { %1088 = vmatprep.subr.bf16.mxu1 %v2730_v45 }
  0x37   : > { %1046 = vmatpush1.bf16.msra.mxu0 %v2713_v42 }
  0x38   : > { %1047 = vmatprep.subr.bf16.mxu0 %v2721_v44  ;;  %1089 = vmatpush1.bf16.msra.mxu1 %v2728_v47 }
  0x39   : > { %1090 = vmatprep.subr.bf16.mxu1 %v2736_v49 }
  0x3b   : > { %1048 = vmatpush1.bf16.msra.mxu0 %v2719_v46 }
  0x3c   : > { %1049 = vmatprep.subr.bf16.mxu0 %v2727_v48  ;;  %1091 = vmatpush1.bf16.msra.mxu1 %v2734_v51 }
  0x3d   : > { %1092 = vmatprep.subr.bf16.mxu1 %v2739_v53 }
  0x3f   : > { %1050 = vmatpush1.bf16.msra.mxu0 %v2725_v50 }
  0x40   : > { %1051 = vmatprep.subr.bf16.mxu0 %v2733_v52  ;;  %1093 = vmatpush1.bf16.msra.mxu1 %v2737_v55 }
  0x41   : > { %1094 = vmatprep.subr.bf16.mxu1 %v2742_v56 }
  0x43   : > { %1052 = vmatpush1.bf16.msra.mxu0 %v2731_v54 }
  0x44   : > { %1095 = vmatpush1.bf16.msra.mxu1 %v2740_v57  ;;  %1127 = vmatprep.subr.bf16.mxu0 %v2748_v60 }
  0x45   : > { %1170 = vmatprep.subr.bf16.mxu1 %v2745_v58 }
  0x46   : > { %2433 = vmatmul.mubr.msk.bf16.vlgmr.msra.gmra.mrb[4].mxu0 %vm951_vm0, %v3045_v33 }
  0x47   : > { %1159 = vmatprep.mubr.bf16.mxu0 %v2890_v0  ;;  %2434 = vmatmul.mubr.msk.bf16.vlgmr.msra.gmra.mrb[4].mxu1 %vm951_vm0, %v3045_v33 }
  0x48   : > { %1171 = vmatpush1.bf16.msra.mxu1 %v2743_v59  ;;  %1202 = vmatprep.mubr.bf16.mxu1 %v2890_v0  ;;  %v2757_v0 = vld [vmem:[%s2993_s24 + $0xec] ss:$48 sps:$4 sm:$0xff]   ;;  %s2348_s24 = sshll.u32 %s3343_s14, 1  ;;  %s2487_s14 = sshll.u32 %s2985_s20, 8 }
  0x49   : > { %1128 = vmatpush1.bf16.msra.mxu0 %v2746_v61  ;;  %1172 = vmatprep.subr.bf16.mxu1 %v2751_v62  ;;  %s3123_s12 = scalar_lea.vmem %s3331_s10, %s2348_s24  ;;  %s475_s22 = sadd.s32 %s2349_s21, %s2348_s24 }
  0x4a   : > { %1129 = vmatprep.subr.bf16.mxu0 %v2754_v1  ;;  %s2350_s23 = sshll.u32 %s475_s22, 2  ;;  %s3200_s30 = scalar_lea.vmem %s3325_s4, %s2487_s14 }
  0x4b   : > { %s477_s29 = scalar_lea.vmem %s3326_s5, %s2350_s23  ;;  %s2626_s21 = smul.u32 48, %s2985_s20 }
  0x4c   : > { %1173 = vmatpush1.bf16.msra.mxu1 %v2749_v63  ;;  %v2491_v57 = vld [vmem:[%s477_s29] sm:$0xff]  }
  0x4d   : > { %1130 = vmatpush1.bf16.msra.mxu0 %v2752_v2  ;;  %1174 = vmatprep.subr.bf16.mxu1 %v2757_v0  ;;  %v2492_v58 = vunpack.c.l.bf16 %v2491_v57  ;;  %v2493_v59 = vunpack.c.h.bf16 %v2491_v57  ;;  %s482_s26 = scalar_lea.vmem %s3327_s6, %s2626_s21 }
  0x4e   : > { %1131 = vmatprep.subr.bf16.mxu0 %v2760_v5 }
  0x50   : > { %1175 = vmatpush1.bf16.msra.mxu1 %v2755_v3 }
  0x51   : > { %1132 = vmatpush1.bf16.msra.mxu0 %v2758_v4  ;;  %1176 = vmatprep.subr.bf16.mxu1 %v2763_v6 }
  0x52   : > { %1133 = vmatprep.subr.bf16.mxu0 %v2766_v7 }
  0x54   : > { %1177 = vmatpush1.bf16.msra.mxu1 %v2761_v8 }
  0x55   : > { %1134 = vmatpush1.bf16.msra.mxu0 %v2764_v9  ;;  %1178 = vmatprep.subr.bf16.mxu1 %v2769_v10 }
  0x56   : > { %1135 = vmatprep.subr.bf16.mxu0 %v2772_v11 }
  0x58   : > { %1179 = vmatpush1.bf16.msra.mxu1 %v2767_v12 }
  0x59   : > { %1136 = vmatpush1.bf16.msra.mxu0 %v2770_v13  ;;  %1180 = vmatprep.subr.bf16.mxu1 %v2775_v14 }
  0x5a   : > { %1137 = vmatprep.subr.bf16.mxu0 %v2778_v15 }
  0x5c   : > { %1181 = vmatpush1.bf16.msra.mxu1 %v2773_v16 }
  0x5d   : > { %1138 = vmatpush1.bf16.msra.mxu0 %v2776_v17  ;;  %2561 = vmatprep.subr.bf16.mxu1 %v2891_v18 }
  0x5e   : > { %2573 = vmatprep.subr.bf16.mxu0 %v2891_v18 }
  0x5f   : > { %2436 = vmatmul.mubr.msk.bf16.vlgmr.msra.gmra.mrb[8].mxu1 %vm951_vm0, %v3045_v33 }
  0x60   : > { %2435 = vmatmul.mubr.msk.bf16.vlgmr.msra.gmra.mrb[8].mxu0 %vm951_vm0, %v3045_v33  ;;  %2563 = vmatprep.mubr.msk.bf16.mxu1 %vm2892_vm1, %v2891_v18 }
  0x61   : > { %2575 = vmatprep.mubr.msk.bf16.mxu0 %vm2892_vm1, %v2891_v18 }
 0x101   : > { %v989_v19 = vpop.f32.mrb[0].mxu0  ;;  %v1032_v25 = vpop.f32.mrb[0].mxu1 }
 0x102   : > { %v991_v20 = vpop.f32.mrb[1].mxu0  ;;  %v1034_v26 = vpop.f32.mrb[1].mxu1 }
 0x103   : > { %v993_v21 = vpop.f32.mrb[2].mxu0  ;;  %v1036_v27 = vpop.f32.mrb[2].mxu1 }
 0x104   : > { %v1217_v22 = vpack.c.bf16 %v993_v21, %v989_v19  ;;  %v995_v23 = vpop.f32.mrb[3].mxu0  ;;  %v1440_v30 = vpack.c.bf16 %v1036_v27, %v1032_v25  ;;  %v1038_v31 = vpop.f32.mrb[3].mxu1 }
 0x105   : > { %v1329_v24 = vpack.c.bf16 %v995_v23, %v991_v20  ;;  %v1551_v32 = vpack.c.bf16 %v1038_v31, %v1034_v26 }
 0x119   : > { %v1075_v33 = vpop.f32.mrb[4].mxu0 }
 0x11a   : > { %v1077_v34 = vpop.f32.mrb[5].mxu0  ;;  %v1118_v39 = vpop.f32.mrb[4].mxu1 }
 0x11b   : > { %v1079_v35 = vpop.f32.mrb[6].mxu0  ;;  %v1120_v40 = vpop.f32.mrb[5].mxu1 }
 0x11c   : > { %v1218_v36 = vpack.c.bf16 %v1079_v35, %v1075_v33  ;;  %v1081_v37 = vpop.f32.mrb[7].mxu0  ;;  %v1122_v41 = vpop.f32.mrb[6].mxu1 }
 0x11d   : > { %v1330_v38 = vpack.c.bf16 %v1081_v37, %v1077_v34  ;;  %v1441_v42 = vpack.c.bf16 %v1122_v41, %v1118_v39  ;;  %v1124_v43 = vpop.f32.mrb[7].mxu1 }
 0x11e   : > { %2562 = vmatpush3.bf16.xpose.msra.mxu1 %v1218_v36  ;;  %v1552_v44 = vpack.c.bf16 %v1124_v43, %v1120_v40 }
 0x11f   : > { %2574 = vmatpush3.bf16.xpose.msra.mxu0 %v1330_v38  ;;  %2567 = vmatprep.subr.bf16.mxu1 %v2891_v18 }
 0x120   : > { %2585 = vmatprep.subr.bf16.mxu0 %v2891_v18 }
 0x125   : > { %2564 = vmatmul.mubr.bf16.vlgmr.msra.gmra.mrb[12].mxu1 %v1217_v22 }
 0x126   : > { %2576 = vmatmul.mubr.bf16.vlgmr.msra.gmra.mrb[12].mxu0 %v1329_v24  ;;  %2569 = vmatprep.mubr.msk.bf16.mxu1 %vm2892_vm1, %v2891_v18 }
 0x127   : > { %2586 = vmatpush3.bf16.xpose.msra.mxu0 %v1441_v42  ;;  %2587 = vmatprep.mubr.msk.bf16.mxu0 %vm2892_vm1, %v2891_v18 }
 0x128   : > { %2597 = vmatprep.subr.bf16.mxu0 %v2891_v18 }
 0x12e   : > { %2588 = vmatmul.mubr.bf16.vlgmr.msra.gmra.mrb[16].mxu0 %v1440_v30 }
 0x12f   : > { %2598 = vmatpush3.bf16.xpose.msra.mxu0 %v1552_v44  ;;  %2599 = vmatprep.mubr.msk.bf16.mxu0 %vm2892_vm1, %v2891_v18 }
 0x132   : > { %v3134_v45 = vpop.f32.mrb[8].mxu1 }
 0x133   : > { %v3136_v46 = vpop.f32.mrb[9].mxu1  ;;  %v1161_v47 = vpop.f32.mrb[8].mxu0 }
 0x134   : > { %v3138_v48 = vpop.f32.mrb[10].mxu1  ;;  %v3140_v49 = vpop.f32.mrb[9].mxu0 }
 0x135   : > { %v1442_v50 = vpack.c.bf16 %v3138_v48, %v3134_v45  ;;  %v3144_v51 = vpop.f32.mrb[11].mxu1  ;;  %v1165_v52 = vpop.f32.mrb[10].mxu0 }
 0x136   : > { %2600 = vmatmul.mubr.bf16.vlgmr.msra.gmra.mrb[20].mxu0 %v1551_v32  ;;  %v1553_v53 = vpack.c.bf16 %v3144_v51, %v3136_v46  ;;  %v1219_v54 = vpack.c.bf16 %v1165_v52, %v1161_v47  ;;  %v3148_v55 = vpop.f32.mrb[11].mxu0  ;;  %v2792_v46 = vld [vmem:[%s3200_s30 + $0xc8] sm:$0xff]  }
 0x137   : > { %v1331_v56 = vpack.c.bf16 %v3148_v55, %v3140_v49  ;;  %v2793_v51 = vld [vmem:[%s3200_s30 + $0x28] sm:$0xff]  }
 0x138   : > { %2568 = vmatpush3.bf16.msra.mxu1 %v1219_v54 }
 0x139   : > { %2579 = vmatprep.subr.bf16.mxu1 %v2891_v18 }
 0x1f8   : > { %v1254_v60 = vpop.f32.mrb[12].mxu1 }
 0x1f9   : > { %v1255_v61 = vadd.f32 %v2492_v58, %v1254_v60  ;;  %v2565_v62 = vpop.f32.mrb[13].mxu1  ;;  %v1366_v63 = vpop.f32.mrb[12].mxu0 }
 0x1fa   : > { %v1367_v1 = vadd.f32 %v2492_v58, %v1366_v63  ;;  %v1257_v2 = vpop.f32.mrb[14].mxu1  ;;  %v2577_v3 = vpop.f32.mrb[13].mxu0 }
 0x1fb   : > { %v1258_v0 = vadd.f32 %v2493_v59, %v1257_v2  ;;  %v2566_v4 = vpop.f32.mrb[15].mxu1  ;;  %v1369_v5 = vpop.f32.mrb[14].mxu0  ;;  %v1262_v6 = vsel %vm1261_vm2, %v1255_v61, -inf }
 0x1fc   : > { %v1370_v7 = vadd.f32 %v2493_v59, %v1369_v5  ;;  %1263 = vmax.xlane.f32.xlu0 %v1262_v6  ;;  %v2578_v8 = vpop.f32.mrb[15].mxu0  ;;  %v1373_v9 = vsel %vm1261_vm2, %v1367_v1, -inf }
 0x1fd   : > { %1374 = vmax.xlane.f32.xlu1 %v1373_v9  ;;  %v1265_v10 = vsel %vm1261_vm2, %v1258_v0, -inf }
 0x1fe   : > { %v1376_v11 = vsel %vm1261_vm2, %v1370_v7, -inf }
 0x200   : > { %1266 = vmax.xlane.f32.xlu0 %v1265_v10 }
 0x201   : > { %1377 = vmax.xlane.f32.xlu1 %v1376_v11  ;;  %v1477_v12 = vpop.f32.mrb[16].mxu0 }
 0x202   : > { %v1478_v13 = vadd.f32 %v2492_v58, %v1477_v12  ;;  %v2589_v14 = vpop.f32.mrb[17].mxu0 }
 0x203   : > { %v1480_v15 = vpop.f32.mrb[18].mxu0 }
 0x204   : > { %v1481_v16 = vadd.f32 %v2493_v59, %v1480_v15  ;;  %v2590_v17 = vpop.f32.mrb[19].mxu0  ;;  %v1484_v19 = vsel %vm1261_vm2, %v1478_v13, -inf }
 0x205   : > { %1485 = vmax.xlane.f32.xlu0 %v1484_v19  ;;  %v2780_v17 = vld [vmem:[%s3200_s30] sm:$0xff]   ;;  %v2781_v19 = vld [vmem:[%s3200_s30 + $0x48] sm:$0xff]  }
 0x206   : > { %v1487_v20 = vsel %vm1261_vm2, %v1481_v16, -inf }
 0x207   : > { %1488 = vmax.xlane.f32.xlu1 %v1487_v20  ;;  %v2782_v20 = vld [vmem:[%s3200_s30 + $0x8] sm:$0xff]  }
 0x209   : > { %v1588_v21 = vpop.f32.mrb[20].mxu0 }
 0x20a   : > { %v1589_v22 = vadd.f32 %v2492_v58, %v1588_v21  ;;  %v2601_v23 = vpop.f32.mrb[21].mxu0  ;;  %v2783_v21 = vld [vmem:[%s3200_s30 + $0x50] sm:$0xff]  }
 0x20b   : > { %v1591_v24 = vpop.f32.mrb[22].mxu0  ;;  %v2785_v23 = vld [vmem:[%s3200_s30 + $0x58] sm:$0xff]  }
 0x20c   : > { %v1592_v25 = vadd.f32 %v2493_v59, %v1591_v24  ;;  %v2602_v26 = vpop.f32.mrb[23].mxu0  ;;  %v1595_v27 = vsel %vm1261_vm2, %v1589_v22, -inf  ;;  %v2786_v24 = vld [vmem:[%s3200_s30 + $0x18] sm:$0xff]  }
 0x20d   : > { %1596 = vmax.xlane.f32.xlu0 %v1595_v27  ;;  %v2789_v26 = vld [vmem:[%s3200_s30 + $0x20] sm:$0xff]  }
 0x20e   : > { %v1598_v30 = vsel %vm1261_vm2, %v1592_v25, -inf }
 0x20f   : > { %1599 = vmax.xlane.f32.xlu1 %v1598_v30 }
 0x289   : > { %v1264_v31 = vpop.xlane.xlu0 %1263 }
 0x28a   : > { %v1268_v32 = vsub.f32 %v1255_v61, %v1264_v31  ;;  %v1375_v33 = vpop.xlane.xlu1 %1374 }
 0x28b   : > { %v1379_v34 = vsub.f32 %v1367_v1, %v1375_v33 }
 0x28c   : > { %v1270_v35 = vmul.f32 1.442695, %v1268_v32 }
 0x28d   : > { %v1381_v36 = vmul.f32 1.442695, %v1379_v34  ;;  %v1267_v37 = vpop.xlane.xlu0 %1266 }
 0x28e   : > { %2817 = vpow2.f32 %v1270_v35  ;;  %v1269_v38 = vsub.f32 %v1258_v0, %v1267_v37  ;;  %v1378_v39 = vpop.xlane.xlu1 %1377 }
 0x28f   : > { %v1380_v40 = vsub.f32 %v1370_v7, %v1378_v39  ;;  %2819 = vpow2.f32 %v1381_v36 }
 0x290   : > { %v1272_v41 = vmul.f32 1.442695, %v1269_v38 }
 0x291   : > { %v1383_v42 = vmul.f32 1.442695, %v1380_v40 }
 0x292   : > { %2821 = vpow2.f32 %v1272_v41  ;;  %v1486_v43 = vpop.xlane.xlu0 %1485 }
 0x293   : > { %v1490_v44 = vsub.f32 %v1478_v13, %v1486_v43  ;;  %2823 = vpow2.f32 %v1383_v42 }
 0x294   : > { %v1489_v47 = vpop.xlane.xlu1 %1488 }
 0x295   : > { %v1492_v52 = vmul.f32 1.442695, %v1490_v44  ;;  %v1491_v54 = vsub.f32 %v1481_v16, %v1489_v47  ;;  %v2779_v16 = vld [vmem:[%s3200_s30 + $0x40] sm:$0xff]  }
 0x296   : > { %2510 = vmatprep.subr.bf16.mxu0 %v2779_v16 }
 0x297   : > { %2825 = vpow2.f32 %v1492_v52  ;;  %v1494_v57 = vmul.f32 1.442695, %v1491_v54  ;;  %2511 = vmatpush3.bf16.msra.mxu0 %v2780_v17 }
 0x298   : > { %v3167_v58 = vpop.eup %2817  ;;  %2512 = vmatprep.subr.bf16.mxu0 %v2781_v19 }
 0x299   : > { %2827 = vpow2.f32 %v1494_v57  ;;  %v1274_v59 = vsel %vm1261_vm2, %v3167_v58, 0.0  ;;  %v3171_v60 = vpop.eup %2819 }
 0x29a   : > { %1275 = vadd.xlane.f32.xlu0 %v1274_v59  ;;  %v1597_v61 = vpop.xlane.xlu0 %1596  ;;  %v1385_v0 = vsel %vm1261_vm2, %v3171_v60, 0.0 }
 0x29b   : > { %v1601_v62 = vsub.f32 %v1589_v22, %v1597_v61  ;;  %2513 = vmatpush3.bf16.msra.mxu0 %v2782_v20  ;;  %v2784_v22 = vld [vmem:[%s3200_s30 + $0x10] sm:$0xff]  }
 0x29c   : > { %v2822_v63 = vpop.eup %2821  ;;  %v1600_v1 = vpop.xlane.xlu1 %1599  ;;  %2514 = vmatprep.subr.bf16.mxu0 %v2783_v21 }
 0x29d   : > { %v1603_v2 = vmul.f32 1.442695, %v1601_v62  ;;  %v1602_v3 = vsub.f32 %v1592_v25, %v1600_v1  ;;  %v1277_v4 = vsel %vm1261_vm2, %v2822_v63, 0.0  ;;  %v3176_v5 = vpop.eup %2823  ;;  %v2787_v25 = vld [vmem:[%s3200_s30 + $0x60] sm:$0xff]   ;;  %v2791_v62 = vld [vmem:[%s3200_s30 + $0x68] sm:$0xff]   ;;  %v2796_v1 = vld [vmem:[%s3200_s30 + $0xd0] sm:$0xff]  }
 0x29e   : > { %1386 = vadd.xlane.f32.xlu0 %v1385_v0  ;;  %1278 = vadd.xlane.f32.xlu1 %v1277_v4  ;;  %v1388_v8 = vsel %vm1261_vm2, %v3176_v5, 0.0  ;;  %v2799_v0 = vld [vmem:[%s3200_s30 + $0x78] sm:$0xff]  }
 0x29f   : > { %2829 = vpow2.f32 %v1603_v2  ;;  %v1605_v6 = vmul.f32 1.442695, %v1602_v3  ;;  %2515 = vmatpush3.bf16.msra.mxu0 %v2784_v22  ;;  %v2797_v2 = vld [vmem:[%s3200_s30 + $0x30] sm:$0xff]   ;;  %v2800_v4 = vld [vmem:[%s3200_s30 + $0xd8] sm:$0xff]  }
 0x2a0   : > { %2516 = vmatprep.subr.bf16.mxu0 %v2785_v23  ;;  %v2798_v3 = vld [vmem:[%s3200_s30 + $0x90] sm:$0xff]  }
 0x2a1   : > { %v3178_v7 = vpop.eup %2825  ;;  %2831 = vpow2.f32 %v1605_v6  ;;  %v2802_v6 = vld [vmem:[%s3200_s30 + $0x98] sm:$0xff]  }
 0x2a2   : > { %1389 = vadd.xlane.f32.xlu1 %v1388_v8  ;;  %v1496_v9 = vsel %vm1261_vm2, %v3178_v7, 0.0  ;;  %v2804_v8 = vld [vmem:[%s3200_s30 + $0xa0] sm:$0xff]  }
 0x2a3   : > { %v3184_v10 = vpop.eup %2827  ;;  %1497 = vadd.xlane.f32.xlu0 %v1496_v9  ;;  %2517 = vmatpush3.bf16.msra.mxu0 %v2786_v24  ;;  %v2805_v9 = vld [vmem:[%s3200_s30 + $0xe8] sm:$0xff]  }
 0x2a4   : > { %v1499_v11 = vsel %vm1261_vm2, %v3184_v10, 0.0  ;;  %2518 = vmatprep.subr.bf16.mxu0 %v2787_v25 }
 0x2a6   : > { %1500 = vadd.xlane.f32.xlu1 %v1499_v11  ;;  %v2807_v11 = vld [vmem:[%s3200_s30 + $0xf0] sm:$0xff]  }
 0x2a7   : > { %2519 = vmatpush3.bf16.msra.mxu0 %v2789_v26 }
 0x2a8   : > { %2520 = vmatprep.subr.bf16.mxu0 %v2791_v62 }
 0x2a9   : > { %v3188_v12 = vpop.eup %2829 }
 0x2aa   : > { %v1607_v13 = vsel %vm1261_vm2, %v3188_v12, 0.0 }
 0x2ab   : > { %v3192_v14 = vpop.eup %2831  ;;  %1608 = vadd.xlane.f32.xlu0 %v1607_v13  ;;  %2521 = vmatpush3.bf16.msra.mxu0 %v2793_v51  ;;  %v2809_v13 = vld [vmem:[%s3200_s30 + $0xf8] sm:$0xff]  }
 0x2ac   : > { %v1610_v15 = vsel %vm1261_vm2, %v3192_v14, 0.0 }
 0x2ad   : > { %1611 = vadd.xlane.f32.xlu1 %v1610_v15 }
 0x327   : > { %v1276_v27 = vpop.xlane.xlu0 %1275 }
 0x328   : > { %2833 = vrcp.f32 %v1276_v27 }
 0x32b   : > { %v1279_v30 = vpop.xlane.xlu1 %1278  ;;  %v1387_v32 = vpop.xlane.xlu0 %1386 }
 0x32c   : > { %2835 = vrcp.f32 %v1279_v30 }
 0x32f   : > { %v1390_v31 = vpop.xlane.xlu1 %1389 }
 0x330   : > { %2837 = vrcp.f32 %v1390_v31  ;;  %v1498_v38 = vpop.xlane.xlu0 %1497 }
 0x331   : > { %2839 = vrcp.f32 %v1387_v32 }
 0x332   : > { %v2834_v33 = vpop.eup %2833 }
 0x333   : > { %v1501_v34 = vpop.xlane.xlu1 %1500  ;;  %v1282_v36 = vmul.f32 %v2834_v33, %v3167_v58  ;;  %v2788_v58 = vld [vmem:[%s3200_s30 + $0xc0] sm:$0xff]  }
 0x334   : > { %2841 = vrcp.f32 %v1501_v34 }
 0x335   : > { %2843 = vrcp.f32 %v1498_v38  ;;  %v2811_v38 = vld [vmem:[%s482_s26] sm:$0xff]  }
 0x336   : > { %v2836_v35 = vpop.eup %2835 }
 0x337   : > { %v1283_v37 = vmul.f32 %v2836_v35, %v2822_v63  ;;  %v2795_v63 = vld [vmem:[%s3200_s30 + $0x70] sm:$0xff]  }
 0x338   : > { %v1609_v47 = vpop.xlane.xlu0 %1608  ;;  %2522 = vmatprep.subr.bf16.mxu0 %v2795_v63 }
 0x339   : > { %v1284_v39 = vpack.c.bf16 %v1283_v37, %v1282_v36  ;;  %2523 = vmatpush3.bf16.msra.mxu0 %v2797_v2 }
 0x33a   : > { %v2838_v40 = vpop.eup %2837  ;;  %v1612_v43 = vpop.xlane.xlu1 %1611  ;;  %2524 = vmatprep.subr.bf16.mxu0 %v2799_v0 }
 0x33b   : > { %2570 = vmatmul.mubr.msk.bf16.vlgmr.msra.gmra.mrb[16].mxu1 %vm1261_vm2, %v1284_v39  ;;  %v2840_v41 = vpop.eup %2839  ;;  %v1394_v42 = vmul.f32 %v2838_v40, %v3176_v5  ;;  %2845 = vrcp.f32 %v1612_v43  ;;  %v2801_v5 = vld [vmem:[%s3200_s30 + $0x38] sm:$0xff]   ;;  %v2812_v39 = vld [vmem:[%s482_s26 + $0x8] sm:$0xff]   ;;  %v2813_v40 = vld [vmem:[%s482_s26 + $0x10] sm:$0xff]  }
 0x33c   : > { %2580 = vmatpush3.bf16.msra.mxu1 %v1331_v56  ;;  %2581 = vmatprep.mubr.msk.bf16.mxu1 %vm2892_vm1, %v2891_v18  ;;  %v1393_v44 = vmul.f32 %v2840_v41, %v3171_v60  ;;  %2847 = vrcp.f32 %v1609_v47  ;;  %v2790_v60 = vld [vmem:[%s3200_s30 + $0x80] sm:$0xff]   ;;  %v2814_v41 = vld [vmem:[%s482_s26 + $0x18] sm:$0xff]   ;;  %v2816_v43 = vld [vmem:[%s482_s26 + $0x28] sm:$0xff]  }
 0x33d   : > { %2591 = vmatprep.subr.bf16.mxu1 %v2891_v18  ;;  %2525 = vmatpush3.bf16.msra.mxu0 %v2801_v5 }
 0x33e   : > { %v1395_v52 = vpack.c.bf16 %v1394_v42, %v1393_v44  ;;  %v2842_v54 = vpop.eup %2841  ;;  %2609 = vmatprep.subr.bf16.mxu0 %v2891_v18  ;;  %v2815_v42 = vld [vmem:[%s482_s26 + $0x20] sm:$0xff]  }
 0x33f   : > { %v2844_v49 = vpop.eup %2843  ;;  %v1505_v55 = vmul.f32 %v2842_v54, %v3184_v10  ;;  %v2806_v10 = vld [vmem:[%s3200_s30 + $0xa8] sm:$0xff]  }
 0x340   : > { %v1504_v56 = vmul.f32 %v2844_v49, %v3178_v7  ;;  %v2803_v7 = vld [vmem:[%s3200_s30 + $0xe0] sm:$0xff]  }
 0x342   : > { %v1506_v57 = vpack.c.bf16 %v1505_v55, %v1504_v56 }
 0x343   : > { %2582 = vmatmul.mubr.msk.bf16.vlgmr.msra.gmra.mrb[20].mxu1 %vm1261_vm2, %v1395_v52 }
 0x344   : > { %2592 = vmatpush3.bf16.msra.mxu1 %v1442_v50  ;;  %2593 = vmatprep.mubr.msk.bf16.mxu1 %vm2892_vm1, %v2891_v18 }
 0x345   : > { %2603 = vmatprep.subr.bf16.mxu1 %v2891_v18  ;;  %v2846_v59 = vpop.eup %2845 }
 0x346   : > { %v2848_v45 = vpop.eup %2847  ;;  %v1616_v48 = vmul.f32 %v2846_v59, %v3192_v14  ;;  %v2810_v14 = vld [vmem:[%s3200_s30 + $0xb8] sm:$0xff]  }
 0x347   : > { %v1615_v50 = vmul.f32 %v2848_v45, %v3188_v12  ;;  %v2808_v12 = vld [vmem:[%s3200_s30 + $0xb0] sm:$0xff]  }
 0x349   : > { %v1617_v61 = vpack.c.bf16 %v1616_v48, %v1615_v50 }
 0x34b   : > { %2594 = vmatmul.mubr.msk.bf16.vlgmr.msra.gmra.mrb[24].mxu1 %vm1261_vm2, %v1506_v57 }
 0x34c   : > { %2604 = vmatpush3.bf16.msra.mxu1 %v1553_v53  ;;  %2605 = vmatprep.mubr.msk.bf16.mxu1 %vm2892_vm1, %v2891_v18  ;;  %v2794_v53 = vld [vmem:[%s3200_s30 + $0x88] sm:$0xff]  }
 0x34d   : > { %2532 = vmatprep.subr.bf16.mxu1 %v2788_v58 }
 0x353   : > { %2606 = vmatmul.mubr.msk.bf16.vlgmr.msra.gmra.mrb[28].mxu1 %vm1261_vm2, %v1617_v61 }
 0x354   : > { %2533 = vmatpush3.bf16.msra.mxu1 %v2790_v60 }
 0x355   : > { %2534 = vmatprep.subr.bf16.mxu1 %v2792_v46 }
 0x358   : > { %2535 = vmatpush3.bf16.msra.mxu1 %v2794_v53 }
 0x359   : > { %2536 = vmatprep.subr.bf16.mxu1 %v2796_v1 }
 0x35c   : > { %2537 = vmatpush3.bf16.msra.mxu1 %v2798_v3 }
 0x35d   : > { %2538 = vmatprep.subr.bf16.mxu1 %v2800_v4 }
 0x360   : > { %2539 = vmatpush3.bf16.msra.mxu1 %v2802_v6 }
 0x361   : > { %2540 = vmatprep.subr.bf16.mxu1 %v2803_v7 }
 0x364   : > { %2541 = vmatpush3.bf16.msra.mxu1 %v2804_v8 }
 0x365   : > { %2542 = vmatprep.subr.bf16.mxu1 %v2805_v9 }
 0x368   : > { %2543 = vmatpush3.bf16.msra.mxu1 %v2806_v10 }
 0x369   : > { %2544 = vmatprep.subr.bf16.mxu1 %v2807_v11 }
 0x36c   : > { %2545 = vmatpush3.bf16.msra.mxu1 %v2808_v12 }
 0x36d   : > { %2546 = vmatprep.subr.bf16.mxu1 %v2809_v13 }
 0x370   : > { %2547 = vmatpush3.bf16.msra.mxu1 %v2810_v14 }
 0x40e   : > { %v1322_v15 = vpop.f32.mrb[16].mxu1 }
 0x40f   : > { %v2571_v16 = vpop.f32.mrb[17].mxu1 }
 0x410   : > { %v1325_v17 = vpop.f32.mrb[18].mxu1 }
 0x411   : > { %v1662_v19 = vpack.c.bf16 %v1325_v17, %v1322_v15  ;;  %v2572_v20 = vpop.f32.mrb[19].mxu1 }
 0x416   : > { %v1433_v21 = vpop.f32.mrb[20].mxu1 }
 0x417   : > { %v2583_v22 = vpop.f32.mrb[21].mxu1 }
 0x418   : > { %v1436_v23 = vpop.f32.mrb[22].mxu1 }
 0x419   : > { %v1663_v24 = vpack.c.bf16 %v1436_v23, %v1433_v21  ;;  %v2584_v25 = vpop.f32.mrb[23].mxu1 }
 0x41b   : > { %1954 = vmatprep.mubr.bf16.mxu0 %v1663_v24 }
 0x41c   : > { %1955 = vmatmul.mubr.bf16.vlgmr.msra.gmra.mrb[24].mxu0 %v1662_v19 }
 0x41d   : > { %2621 = vmatprep.mubr.msk.bf16.mxu0 %vm2892_vm1, %v2891_v18  ;;  %2610 = vmatpush3.bf16.msra.mxu0 %v2811_v38 }
 0x41e   : > { %v1544_v26 = vpop.f32.mrb[24].mxu1  ;;  %2611 = vmatprep.subr.bf16.mxu0 %v2891_v18 }
 0x41f   : > { %v2595_v27 = vpop.f32.mrb[25].mxu1 }
 0x420   : > { %v1547_v30 = vpop.f32.mrb[26].mxu1 }
 0x421   : > { %v1664_v31 = vpack.c.bf16 %v1547_v30, %v1544_v26  ;;  %v2596_v32 = vpop.f32.mrb[27].mxu1  ;;  %2612 = vmatpush3.bf16.msra.mxu0 %v2812_v39 }
 0x422   : > { %2613 = vmatprep.subr.bf16.mxu0 %v2891_v18 }
 0x425   : > { %2614 = vmatpush3.bf16.msra.mxu0 %v2813_v40 }
 0x426   : > { %v1655_v33 = vpop.f32.mrb[28].mxu1  ;;  %2615 = vmatprep.subr.bf16.mxu0 %v2891_v18 }
 0x427   : > { %v2607_v34 = vpop.f32.mrb[29].mxu1 }
 0x428   : > { %v1658_v35 = vpop.f32.mrb[30].mxu1 }
 0x429   : > { %v1665_v36 = vpack.c.bf16 %v1658_v35, %v1655_v33  ;;  %v2608_v37 = vpop.f32.mrb[31].mxu1  ;;  %2616 = vmatpush3.bf16.msra.mxu0 %v2814_v41 }
 0x42a   : > { %2617 = vmatprep.subr.bf16.mxu0 %v2891_v18 }
 0x42b   : > { %1995 = vmatprep.mubr.bf16.mxu1 %v1665_v36 }
 0x42c   : > { %1996 = vmatmul.mubr.bf16.vlgmr.msra.gmra.mrb[32].mxu1 %v1664_v31 }
 0x42d   : > { %2618 = vmatpush3.bf16.msra.mxu0 %v2815_v42 }
 0x42e   : > { %2619 = vmatprep.subr.bf16.mxu0 %v2891_v18 }
 0x431   : > { %2620 = vmatpush3.bf16.msra.mxu0 %v2816_v43 }
 0x4ef   : > { %v2526_v44 = vpop.f32.mrb[24].mxu0 }
 0x4f0   : > { %v2527_v47 = vpop.f32.mrb[25].mxu0 }
 0x4f1   : > { %v2528_v52 = vadd.f32 %v2527_v47, %v2526_v44  ;;  %v2529_v54 = vpop.f32.mrb[26].mxu0 }
 0x4f2   : > { %v2530_v49 = vpop.f32.mrb[27].mxu0 }
 0x4f3   : > { %v2531_v55 = vadd.f32 %v2530_v49, %v2529_v54 }
 0x4ff   : > { %v2548_v56 = vpop.f32.mrb[32].mxu1 }
 0x500   : > { %v2549_v57 = vpop.f32.mrb[33].mxu1 }
 0x501   : > { %v2550_v58 = vadd.f32 %v2549_v57, %v2548_v56  ;;  %v2551_v59 = vpop.f32.mrb[34].mxu1 }
 0x502   : > { %v2552_v45 = vpop.f32.mrb[35].mxu1 }
 0x503   : > { %v1998_v48 = vadd.f32 %v2550_v58, %v2528_v52  ;;  %v2553_v50 = vadd.f32 %v2552_v45, %v2551_v59 }
 0x505   : > { %v2001_v60 = vadd.f32 %v2553_v50, %v2531_v55  ;;  %v2004_v61 = vadd.f32 %v1998_v48, %v3036_v28 }
 0x507   : > { %v2005_v18 = vadd.f32 %v2001_v60, %v3038_v29 }
 0x509   : > { %v2006_v62 = vpack.c.bf16 %v2005_v18, %v2004_v61 }
 0x50b   : > { %2622 = vmatmul.mubr.msk.bf16.vlgmr.msra.gmra.mrb[28].mxu0 %vm951_vm0, %v2006_v62 }
 0x5db   : > { %2102 = sbr.rel (%p2480_p7) target bundleno = 1506 (0x5e2), region = 60 }
 0x5de   : > { %v2092_v46 = vpop.f32.mrb[28].mxu0 }
 0x5df   : > { %v2623_v51 = vpop.f32.mrb[29].mxu0  ;;  %2103 = vst.msk [vmem:[%s3005_s11] sm:$0xff] (!%p2480_p7), %vm951_vm0, %v2092_v46 }
 0x5e0   : > { %v2095_v53 = vpop.f32.mrb[30].mxu0 }
 0x5e1   : > { %v2624_v63 = vpop.f32.mrb[31].mxu0  ;;  %2104 = vst.msk [vmem:[%s3005_s11 + $0x8] sm:$0xff] (!%p2480_p7), %vm951_vm0, %v2095_v53 }
 0x5e2 PF: > { %p2481_p8 = scmp.eq.s32.totalorder %s2872_s13, 0 }
 0x5e4   : > { %2108 = sbr.rel (%p2481_p8) target bundleno = 1516 (0x5ec), region = 64 }
 0x5e6   : > { %v2109_v28 = vld [vmem:[%s3005_s11] sm:$0xff] (!%p2481_p8) }
 0x5e7   : > { %v2111_v1 = vadd.f32 (!%p2481_p8), %v2109_v28, %v2092_v46 }
 0x5e8   : > { %v2110_v29 = vld [vmem:[%s3005_s11 + $0x8] sm:$0xff] (!%p2481_p8) }
 0x5e9   : > { %v2112_v2 = vadd.f32 (!%p2481_p8), %v2110_v29, %v2095_v53  ;;  %2113 = vst.msk [vmem:[%s3005_s11] sm:$0xff] (!%p2481_p8), %vm951_vm0, %v2111_v1 }
 0x5eb   : > { %2114 = vst.msk [vmem:[%s3005_s11 + $0x8] sm:$0xff] %vm951_vm0, %v2112_v2 }
 0x5ec PF: > { %p2482_p9 = scmp.ne.s32.totalorder %s2872_s13, 2 }
 0x5ed   : > { %v2134_v3 = vld [vmem:[%s3000_s28] sm:$0xff] (!%p2482_p9)  ;;  %v2893_v4 = vmov (!%p2482_p9), 0   ;;  %v2135_v9 = vld [vmem:[%s3000_s28 + $0x8] sm:$0xff] (!%p2482_p9)  ;;  %vm2168_vm3 = vcmask (!%p2482_p9), 1040384   ;;  %vm2170_vm4 = vcmask (!%p2482_p9), 779264  }
 0x5ee   : > { %2118 = sbr.rel (%p2482_p9) target bundleno = 1672 (0x688), region = 68  ;;  %2849 = vset.pattern.permute.xlu0 (!%p2482_p9), %v2893_v4  ;;  %v2483_v5 = vld [vmem:[%s3328_s7] ss:$0 sm:$0xff] (!%p2482_p9) }
 0x5ef   : > { %2138 = vperm.xlu0 (!%p2482_p9), %2849, %v2134_v3  }
 0x5f1   : > { %v2119_v0 = vld [vmem:[%s3005_s11] sm:$0xff] (!%p2482_p9) }
 0x5f2   : > { %v2120_v6 = vld [vmem:[%s3005_s11 + $0x8] sm:$0xff] (!%p2482_p9)  ;;  %v2128_v7 = vadd.f32 (!%p2482_p9), %v2483_v5, %v2119_v0 }
 0x5f3   : > { %v2129_v8 = vadd.f32 (!%p2482_p9), %v2483_v5, %v2120_v6  ;;  %2143 = vperm.xlu0 (!%p2482_p9), %2849, %v2135_v9  }
 0x5f4   : > { %v2130_v10 = vmax.f32 (!%p2482_p9), %v2128_v7, 0.0 }
 0x5f5   : > { %v2131_v11 = vmax.f32 %v2129_v8, 0.0 }
 0x5f6   : > { %2132 = vst.msk [vmem:[%s3005_s11] sm:$0xff] %vm951_vm0, %v2130_v10 }
 0x5f7   : > { %2133 = vst.msk [vmem:[%s3005_s11 + $0x8] sm:$0xff] %vm951_vm0, %v2131_v11 }
 0x66e   : > { %v2139_v12 = vpop.permute.xlu0 %2138 }
 0x66f   : > { %v2146_v13 = vmul.f32 %v2139_v12, %v2130_v10 }
 0x671   : > { %v2157_v15 = vmul.f32 %v2146_v13, %v2130_v10  ;;  %v2148_v17 = vsel %vm951_vm0, %v2146_v13, 0.0 }
 0x672   : > { %v2144_v14 = vpop.permute.xlu0 %2143 }
 0x673   : > { %v2147_v16 = vmul.f32 %v2144_v14, %v2131_v11  ;;  %v2159_v22 = vsel %vm951_vm0, %v2157_v15, 0.0 }
 0x675   : > { %v2149_v19 = vsel %vm951_vm0, %v2147_v16, 0.0  ;;  %v2158_v20 = vmul.f32 %v2147_v16, %v2131_v11 }
 0x676   : > { %v2150_v21 = vadd.f32 %v2149_v19, %v2148_v17 }
 0x677   : > { %v2160_v23 = vsel %vm951_vm0, %v2158_v20, 0.0 }
 0x678   : > { %v2151_v24 = vrot.slane %v2150_v21, 4  ;;  %v2161_v25 = vadd.f32 %v2160_v23, %v2159_v22 }
 0x67a   : > { %v2152_v26 = vadd.f32 %v2151_v24, %v2150_v21  ;;  %v2162_v27 = vrot.slane %v2161_v25, 4 }
 0x67c   : > { %v2153_v30 = vrot.slane %v2152_v26, 2  ;;  %v2163_v31 = vadd.f32 %v2162_v27, %v2161_v25 }
 0x67e   : > { %v2154_v32 = vadd.f32 %v2153_v30, %v2152_v26  ;;  %v2164_v33 = vrot.slane %v2163_v31, 2 }
 0x680   : > { %v2155_v34 = vrot.slane %v2154_v32, 1  ;;  %v2165_v35 = vadd.f32 %v2164_v33, %v2163_v31 }
 0x682   : > { %v2166_v36 = vrot.slane %v2165_v35, 1  ;;  %v2156_v37 = vadd.f32 %v2155_v34, %v2154_v32 }
 0x684   : > { %v2167_v38 = vadd.f32 %v2166_v36, %v2165_v35 }
 0x686   : > { %v2169_v39 = vsel %vm2168_vm3, %v2156_v37, %v2167_v38 }
 0x687   : > { %2171 = vst.msk [vmem:[%s3123_s12] sm:$0x3] %vm2170_vm4, %v2169_v39 }
 0x688 PF: > { %s21_s17 = sadd.s32 1, %s2888_s17   ;;  %s3332_s13 = smov %s2880_s15 }
 0x689   : > { %p18_p10 = scmp.ge.s32.totalorder %s21_s17, 8   ;;  %s3333_s14 = smov %s2884_s16 }
 0x68a   : > { %s3334_s15 = smov %s3337_s18  ;;  %s3335_s16 = smov %s3341_s19 }
 0x68b   :  { %20 = sbr.rel (!%p18_p10) target bundleno = 3 (0x3), region = 125 }

// kernel: mgt_forward.11
= control target key start
LH: loop header
LB: loop body
LE: loop exit
PB: predicated region body
PF: predicated region fallthrough
CT: control target
= control target key end

     0   :  { %v541_v2 = vmov 0   ;;  %v542_v6 = vmov 0.0   ;;  %s723_s0 = inlined_call_operand.vmem [shape: f32[2,16,96], index: 0, kind: input, shape index: {}]   ;;  %s724_s1 = inlined_call_operand.vmem [shape: f32[1,96], index: 1, kind: input, shape index: {}]   ;;  %s725_s2 = inlined_call_operand.vmem [shape: f32[1,96], index: 2, kind: input, shape index: {}]   ;;  %s726_s3 = inlined_call_operand.vmem [shape: f32[2,16,1], index: 3, kind: input, shape index: {}]   ;;  %s727_s4 = inlined_call_operand.vmem [shape: bf16[96,64], index: 4, kind: input, shape index: {}]   ;;  %s728_s5 = inlined_call_operand.vmem [shape: f32[1,64], index: 5, kind: input, shape index: {}]   ;;  %s729_s6 = inlined_call_operand.vmem [shape: bf16[64,64], index: 6, kind: input, shape index: {}]   ;;  %s730_s7 = inlined_call_operand.vmem [shape: f32[1,64], index: 7, kind: input, shape index: {}]   ;;  %s731_s8 = inlined_call_operand.vmem [shape: bf16[64,10], index: 8, kind: input, shape index: {}]   ;;  %s732_s9 = inlined_call_operand.vmem [shape: f32[1,10], index: 9, kind: input, shape index: {}]   ;;  %s733_s10 = inlined_call_operand.hbm [shape: f32[2,10], index: 10, kind: output, shape index: {}]  }
   0x1   :  { %v65_v0 = vld [vmem:[%s726_s3 + $0x10] sm:$0xff]  ;;  %v63_v1 = vld [vmem:[%s726_s3] sm:$0xff]  ;;  %498 = vset.pattern.permute.xlu1 %v541_v2  ;;  %497 = vset.pattern.permute.xlu0 %v541_v2  ;;  %v66_v3 = vld [vmem:[%s726_s3 + $0x18] sm:$0xff] }
   0x2   :  { %79 = vperm.xlu1 %498, %v65_v0   ;;  %69 = vperm.xlu0 %497, %v63_v1   ;;  %v64_v4 = vld [vmem:[%s726_s3 + $0x8] sm:$0xff]  ;;  %v499_v5 = vld [vmem:[%s727_s4] sm:$0xff]   ;;  %v501_v8 = vld [vmem:[%s727_s4 + $0x10] sm:$0xff]  }
   0x3   :  { %453 = vmatprep.subr.bf16.mxu0 %v542_v6  ;;  %469 = vmatprep.subr.bf16.mxu1 %v542_v6  ;;  %v500_v7 = vld [vmem:[%s727_s4 + $0x8] sm:$0xff]  }
   0x4   :  { %454 = vmatpush3.bf16.msra.mxu0 %v499_v5 }
   0x5   :  { %455 = vmatprep.subr.bf16.mxu0 %v542_v6 }
   0x6   :  { %84 = vperm.xlu1 %498, %v66_v3   ;;  %74 = vperm.xlu0 %497, %v64_v4  }
   0x8   :  { %456 = vmatpush3.bf16.msra.mxu0 %v500_v7 }
   0x9   :  { %457 = vmatprep.subr.bf16.mxu0 %v542_v6 }
   0xa   :  { %15 = vsyncpa [#allocation3], 0  ;;  %v502_v9 = vld [vmem:[%s727_s4 + $0x18] sm:$0xff]   ;;  %v503_v10 = vld [vmem:[%s727_s4 + $0x20] sm:$0xff]   ;;  %vm543_vm0 = vmmov 0   ;;  %vm91_vm1 = vcmask 785408  }
   0xb   :  { %v504_v11 = vld [vmem:[%s727_s4 + $0x28] sm:$0xff]   ;;  %465 = vmatprep.mubr.msk.bf16.mxu0 %vm543_vm0, %v542_v6  ;;  %477 = vmatprep.mubr.msk.bf16.mxu1 %vm543_vm0, %v542_v6  ;;  %v505_v12 = vld [vmem:[%s729_s6] sm:$0xff]   ;;  %v39_v14 = vld [vmem:[%s723_s0 + $0x10] sm:$0xff]  ;;  %vm135_vm2 = vcmask 1041409   ;;  %vm258_vm3 = vcmask 523264   ;;  %vm386_vm4 = vcmask 74752  }
   0xc   :  { %458 = vmatpush3.bf16.msra.mxu0 %v501_v8  ;;  %470 = vmatpush3.bf16.msra.mxu1 %v505_v12  ;;  %v506_v13 = vld [vmem:[%s729_s6 + $0x8] sm:$0xff]   ;;  %v414_v15 = vld [vmem:[%s724_s1] ss:$0 sm:$0xff]  ;;  %v40_v17 = vld [vmem:[%s723_s0 + $0x18] sm:$0xff] }
   0xd   :  { %459 = vmatprep.subr.bf16.mxu0 %v542_v6  ;;  %471 = vmatprep.subr.bf16.mxu1 %v542_v6  ;;  %v37_v16 = vld [vmem:[%s723_s0] sm:$0xff]  ;;  %v38_v18 = vld [vmem:[%s723_s0 + $0x8] sm:$0xff]  ;;  %v50_v19 = vmul.f32 %v414_v15, %v39_v14  ;;  %v51_v22 = vmul.f32 %v414_v15, %v40_v17  ;;  %v507_v60 = vld [vmem:[%s729_s6 + $0x10] sm:$0xff]  }
   0xe   :  { %v48_v20 = vmul.f32 %v414_v15, %v37_v16  ;;  %v415_v21 = vld [vmem:[%s725_s2] ss:$0 sm:$0xff]  ;;  %v49_v23 = vmul.f32 %v414_v15, %v38_v18  ;;  %v508_v61 = vld [vmem:[%s729_s6 + $0x18] sm:$0xff]   ;;  %v510_v8 = vld [vmem:[%s731_s8 + $0x8] sm:$0xff]  }
   0xf   :  { %v61_v24 = vadd.f32 %v415_v21, %v50_v19  ;;  %v62_v28 = vadd.f32 %v415_v21, %v51_v22  ;;  %v416_v62 = vld [vmem:[%s728_s5] ss:$0 sm:$0xff] }
  0x10   :  { %460 = vmatpush3.bf16.msra.mxu0 %v502_v9  ;;  %472 = vmatpush3.bf16.msra.mxu1 %v506_v13  ;;  %v59_v25 = vadd.f32 %v415_v21, %v48_v20  ;;  %v60_v29 = vadd.f32 %v415_v21, %v49_v23  ;;  %v509_v5 = vld [vmem:[%s731_s8] sm:$0xff]   ;;  %v511_v9 = vld [vmem:[%s731_s8 + $0x10] sm:$0xff]  }
  0x11   :  { %461 = vmatprep.subr.bf16.mxu0 %v542_v6  ;;  %473 = vmatprep.subr.bf16.mxu1 %v542_v6 }
  0x14   :  { %462 = vmatpush3.bf16.msra.mxu0 %v503_v10  ;;  %474 = vmatpush3.bf16.msra.mxu1 %v507_v60  ;;  %v512_v10 = vld [vmem:[%s731_s8 + $0x18] sm:$0xff]  }
  0x15   :  { %463 = vmatprep.subr.bf16.mxu0 %v542_v6  ;;  %475 = vmatprep.subr.bf16.mxu1 %v542_v6 }
  0x18   :  { %464 = vmatpush3.bf16.msra.mxu0 %v504_v11  ;;  %476 = vmatpush3.bf16.msra.mxu1 %v508_v61  ;;  %v424_v11 = vld [vmem:[%s730_s7] ss:$0 sm:$0xff]  ;;  %s544_s7 = smov [#allocation2]  }
  0x19   :  { %481 = vmatprep.subr.bf16.mxu1 %v542_v6  ;;  %s406_s8 = sshll.u32 %s544_s7, 4  ;;  %s407_s8 = int_to_ptr.vmem [resolvable:$true] %s406_s8 }
  0x1a   :  { %p522_p1 = scmp.lt.s32.totalorder %s407_s8, %s407_s8 }
  0x81   :  { %v80_v26 = vpop.permute.xlu1 %79  ;;  %v70_v27 = vpop.permute.xlu0 %69 }
  0x82   :  { %v89_v30 = vmul.f32 %v80_v26, %v61_v24  ;;  %v87_v31 = vmul.f32 %v70_v27, %v59_v25 }
  0x84   :  { %v101_v36 = vsel %vm91_vm1, %v89_v30, 0.0  ;;  %v92_v37 = vsel %vm91_vm1, %v87_v31, 0.0 }
  0x85   :  { %v85_v32 = vpop.permute.xlu1 %84  ;;  %v75_v33 = vpop.permute.xlu0 %74 }
  0x86   :  { %v90_v34 = vmul.f32 %v85_v32, %v62_v28  ;;  %v88_v35 = vmul.f32 %v75_v33, %v60_v29 }
  0x88   :  { %v102_v38 = vsel %vm91_vm1, %v90_v34, 0.0  ;;  %v93_v39 = vsel %vm91_vm1, %v88_v35, 0.0 }
  0x89   :  { %v103_v40 = vadd.f32 %v102_v38, %v101_v36  ;;  %v94_v41 = vadd.f32 %v93_v39, %v92_v37 }
  0x8b   :  { %v104_v42 = vrot.slane %v103_v40, 4  ;;  %v95_v43 = vrot.slane %v94_v41, 4 }
  0x8d   :  { %v105_v44 = vadd.f32 %v104_v42, %v103_v40  ;;  %v96_v45 = vadd.f32 %v95_v43, %v94_v41 }
  0x8f   :  { %v106_v46 = vrot.slane %v105_v44, 2  ;;  %v97_v47 = vrot.slane %v96_v45, 2 }
  0x91   :  { %v107_v48 = vadd.f32 %v106_v46, %v105_v44  ;;  %v98_v49 = vadd.f32 %v97_v47, %v96_v45 }
  0x93   :  { %v108_v50 = vrot.slane %v107_v48, 1  ;;  %v99_v51 = vrot.slane %v98_v49, 1 }
  0x95   :  { %v109_v52 = vadd.f32 %v108_v50, %v107_v48  ;;  %v100_v53 = vadd.f32 %v99_v51, %v98_v49 }
  0x97   :  { %v111_v54 = vpack.c.bf16 %v109_v52, %v109_v52  ;;  %v110_v55 = vpack.c.bf16 %v100_v53, %v100_v53 }
  0x99   :  { %v134_v56 = vunpack.c.l.b16 %v111_v54  ;;  %v133_v57 = vunpack.c.l.b16 %v110_v55 }
  0x9b   :  { %v136_v58 = vsel %vm135_vm2, %v134_v56, %v133_v57 }
  0x9c   :  { %v137_v59 = vpack.c.b16 %v136_v58, %v136_v58 }
  0x9e   :  { %466 = vmatmul.mubr.msk.bf16.vlgmr.msra.gmra.mrb[0].mxu0 %vm91_vm1, %v137_v59 }
 0x171   :  { %v211_v63 = vpop.f32.mrb[0].mxu0 }
 0x172   :  { %v212_v0 = vadd.f32 %v416_v62, %v211_v63  ;;  %v467_v1 = vpop.f32.mrb[1].mxu0 }
 0x173   :  { %v214_v2 = vpop.f32.mrb[2].mxu0 }
 0x174   :  { %v217_v3 = vmax.f32 %v212_v0, 0.0  ;;  %v468_v4 = vpop.f32.mrb[3].mxu0 }
 0x176   :  { %v218_v7 = vpack.c.bf16 %v217_v3, %v217_v3 }
 0x178   :  { %478 = vmatmul.mubr.msk.bf16.vlgmr.msra.gmra.mrb[0].mxu1 %vm258_vm3, %v218_v7 }
 0x179   :  { %482 = vmatpush3.bf16.msra.mxu1 %v509_v5  ;;  %489 = vmatprep.mubr.msk.bf16.mxu1 %vm543_vm0, %v542_v6 }
 0x17a   :  { %483 = vmatprep.subr.bf16.mxu1 %v542_v6 }
 0x17d   :  { %484 = vmatpush3.bf16.msra.mxu1 %v510_v8 }
 0x17e   :  { %485 = vmatprep.subr.bf16.mxu1 %v542_v6 }
 0x181   :  { %486 = vmatpush3.bf16.msra.mxu1 %v511_v9 }
 0x182   :  { %487 = vmatprep.subr.bf16.mxu1 %v542_v6  ;;  %v430_v6 = vld [vmem:[%s732_s9] ss:$0 sm:$0xff]  ;;  %s517_s9 = scalar_lea.vmem %s407_s8, 32 }
 0x183   :  { %p518_p0 = scmp.ne.s32.totalorder %s407_s8, %s517_s9  ;;  %p523_p2 = scmp.lt.s32.totalorder %s517_s9, %s517_s9 }
 0x185   :  { %488 = vmatpush3.bf16.msra.mxu1 %v512_v10  ;;  %p524_p3 = por %p523_p2, %p522_p1 }
 0x187   :  { %p525_p4 = pnand %p524_p3, %p518_p0 }
 0x24b   :  { %v296_v12 = vpop.f32.mrb[0].mxu1 }
 0x24c   :  { %v297_v13 = vadd.f32 %v424_v11, %v296_v12  ;;  %v479_v14 = vpop.f32.mrb[1].mxu1 }
 0x24d   :  { %v299_v15 = vpop.f32.mrb[2].mxu1 }
 0x24e   :  { %v302_v16 = vmax.f32 %v297_v13, 0.0  ;;  %v480_v17 = vpop.f32.mrb[3].mxu1 }
 0x250   :  { %v303_v18 = vpack.c.bf16 %v302_v16, %v302_v16 }
 0x252   :  { %490 = vmatmul.mubr.msk.bf16.vlgmr.msra.gmra.mrb[4].mxu1 %vm258_vm3, %v303_v18 }
 0x325   :  { %v380_v19 = vpop.f32.mrb[4].mxu1 }
 0x326   :  { %v381_v20 = vadd.f32 %v430_v6, %v380_v19  ;;  %v491_v21 = vpop.f32.mrb[5].mxu1 }
 0x327   :  { %v383_v22 = vpop.f32.mrb[6].mxu1 }
 0x328   :  { %v492_v23 = vpop.f32.mrb[7].mxu1  ;;  %v387_v24 = vsel %vm386_vm4, %v381_v20, -inf }
 0x329   :  { %388 = vmax.xlane.f32.xlu0 %v387_v24 }
 0x3b6   :  { %v389_v25 = vpop.xlane.xlu0 %388 }
 0x3b7   :  { %v390_v26 = vsub.f32 %v381_v20, %v389_v25 }
 0x3b9   :  { %v391_v27 = vmul.f32 1.442695, %v390_v26 }
 0x3bb   :  { %513 = vpow2.f32 %v391_v27 }
 0x3c5   :  { %v514_v28 = vpop.eup %513 }
 0x3c6   :  { %v393_v29 = vsel %vm386_vm4, %v514_v28, 0.0 }
 0x3c7   :  { %394 = vadd.xlane.f32.xlu1 %v393_v29 }
 0x454   :  { %v395_v30 = vpop.xlane.xlu1 %394 }
 0x455   :  { %515 = vlog2.f32 %v395_v30 }
 0x45f   :  { %v516_v31 = vpop.eup %515 }
 0x460   :  { %v397_v32 = vmul.f32 0.6931472, %v516_v31 }
 0x462   :  { %v398_v33 = vsub.f32 %v390_v26, %v397_v32 }
 0x464   :  { %399 = vst.msk [vmem:[#allocation2] sm:$0x3] %vm386_vm4, %v398_v33 }
 0x465   :  { %528 = shalt.err (!%p525_p4)
}
 0x466   :  { %s529_s20 = scalar_lea.hbm %s733_s10, 32 }
 0x467   :  { %p530_p5 = scmp.ne.s32.totalorder %s733_s10, %s529_s20  ;;  %p533_p6 = scmp.lt.u32.totalorder %s529_s20, %s733_s10 }
 0x469   :  { %p535_p7 = pnand %p533_p6, %p530_p5 }
 0x46b   :  { %538 = shalt.err (!%p535_p7)
}
 0x46c   :  { %409 = dma.vmem_to_hbm [thread:$0]  %s407_s8, 32, %s733_s10, [#allocation3]  }
 0x46d   :  { %539 = dma.done.wait [#allocation3], 32  }
 0x46e   :  { %540 = vsyncadd [#allocation3], 4294967264 }
 0x46f   :  { %413 = vsyncpa [#allocation3], 1 }

</bundles_post_ra>
